<compile_context>
chip_gen: v5e
topology: v5e:2x2
jax: 0.10.0
libtpu: 0.0.40
codegen_flags: <defaults>
</compile_context>

<pallas_src>
import math
import functools

import jax
import jax.numpy as jnp
from jax.experimental import pallas as pl
from jax.experimental.pallas import tpu as pltpu


# ----------------------------------------------------------------------------
# Fused forward-pass kernel (single pallas_call, everything VMEM-resident)
# ----------------------------------------------------------------------------

def _fused_forward_kernel(
    x_ref, pe_ref,
    emb_w_ref, emb_b_ref,
    wq_ref, wk_ref, wv_ref, bq_ref, bk_ref, bv_ref,
    wo_ref, bo_ref,
    ln1_g_ref, ln1_b_ref,
    ff1_w_ref, ff1_b_ref, ff2_w_ref, ff2_b_ref,
    ln2_g_ref, ln2_b_ref,
    cls_w_ref, cls_b_ref,
    g_ref, gt_ref, pool_ref,
    pooled_ref, logits_ref,
    *, L, N, head_dim, eps):
    f32 = jnp.float32
    scale = 1.0 / math.sqrt(head_dim)

    # 1. embedding + positional encoding (one matmul, bias and PE fused)
    h = (jnp.dot(x_ref[...], emb_w_ref[...], preferred_element_type=f32)
         + emb_b_ref[...] + pe_ref[...])                          # (L*N, D)

    # 2. multi-head self-attention (attends over dim0 = L, batched over N*H)
    q = jnp.dot(h, wq_ref[...], preferred_element_type=f32) + bq_ref[...]
    k = jnp.dot(h, wk_ref[...], preferred_element_type=f32) + bk_ref[...]
    v = jnp.dot(h, wv_ref[...], preferred_element_type=f32) + bv_ref[...]

    g = g_ref[...]      # (D, H): sums the head_dim lanes belonging to each head
    gt = gt_ref[...]    # (H, D): broadcasts per-head scalars back to D lanes

    q_rows = [q[i * N:(i + 1) * N, :] for i in range(L)]          # each (N, D)
    k_rows = [k[i * N:(i + 1) * N, :] for i in range(L)]
    v_rows = [v[i * N:(i + 1) * N, :] for i in range(L)]

    out_rows = []
    for lq in range(L):
        # per-(n, head) scores of query position lq against every key position
        s = [jnp.dot(q_rows[lq] * k_rows[lk], g,
                     preferred_element_type=f32) * scale          # (N, H)
             for lk in range(L)]
        m = functools.reduce(jnp.maximum, s)
        e = [jnp.exp(si - m) for si in s]
        inv = 1.0 / functools.reduce(jnp.add, e)
        o = None
        for lk in range(L):
            p_rep = jnp.dot(e[lk] * inv, gt,
                            preferred_element_type=f32)           # (N, D)
            term = p_rep * v_rows[lk]
            o = term if o is None else o + term
        out_rows.append(o)
    attn = jnp.concatenate(out_rows, axis=0)                      # (L*N, D)
    attn = jnp.dot(attn, wo_ref[...], preferred_element_type=f32) + bo_ref[...]

    # 3. residual + LayerNorm 1
    y = h + attn
    mu = jnp.mean(y, axis=-1, keepdims=True)
    var = jnp.mean(jnp.square(y - mu), axis=-1, keepdims=True)
    y = (y - mu) * jax.lax.rsqrt(var + eps) * ln1_g_ref[...] + ln1_b_ref[...]

    # 4. feed-forward (relu), single full-width matmuls (no N-tiling grid)
    f1 = jnp.dot(y, ff1_w_ref[...], preferred_element_type=f32) + ff1_b_ref[...]
    f1 = jnp.maximum(f1, 0.0)                                     # (L*N, DFF)
    f2 = jnp.dot(f1, ff2_w_ref[...], preferred_element_type=f32) + ff2_b_ref[...]

    # 5. residual + LayerNorm 2
    z = y + f2
    mu2 = jnp.mean(z, axis=-1, keepdims=True)
    var2 = jnp.mean(jnp.square(z - mu2), axis=-1, keepdims=True)
    z = (z - mu2) * jax.lax.rsqrt(var2 + eps) * ln2_g_ref[...] + ln2_b_ref[...]

    # 6. x.mean(dim=1) in the user's (B, S, D) view via a constant pooling
    #    matmul, then the classification head — all in the same kernel epilogue
    pooled = jnp.dot(pool_ref[...], z, preferred_element_type=f32)    # (B, D)
    logits = (jnp.dot(pooled, cls_w_ref[...], preferred_element_type=f32)
              + cls_b_ref[...])                                       # (B, NC)

    pooled_ref[...] = pooled
    logits_ref[...] = logits


# ----------------------------------------------------------------------------
# Parameters / positional encoding (plain JAX glue, trace-time constants)
# ----------------------------------------------------------------------------

def positional_encoding(d_model, max_len=243):
    position = jnp.arange(max_len, dtype=jnp.float32)[:, None]
    div_term = jnp.exp(jnp.arange(0, d_model, 2, dtype=jnp.float32)
                       * (-math.log(10000.0) / d_model))
    pe = jnp.zeros((max_len, d_model), jnp.float32)
    pe = pe.at[:, 0::2].set(jnp.sin(position * div_term))
    pe = pe.at[:, 1::2].set(jnp.cos(position * div_term))
    return pe[None]  # (1, max_len, d_model)


def init_params(key, n_features, d_model, d_ff, n_classes):
    ks = jax.random.split(key, 12)
    w = lambda k, shape: 0.02 * jax.random.normal(k, shape, dtype=jnp.float32)
    return {
        # weights stored already transposed: (in_features, out_features)
        "emb_w": w(ks[0], (n_features, d_model)),
        "emb_b": w(ks[1], (d_model,)),
        "in_proj_w": w(ks[2], (d_model, 3 * d_model)),
        "in_proj_b": w(ks[3], (3 * d_model,)),
        "out_proj_w": w(ks[4], (d_model, d_model)),
        "out_proj_b": w(ks[5], (d_model,)),
        "ln1_g": jnp.ones((d_model,), jnp.float32),
        "ln1_b": jnp.zeros((d_model,), jnp.float32),
        "ff1_w": w(ks[6], (d_model, d_ff)),
        "ff1_b": w(ks[7], (d_ff,)),
        "ff2_w": w(ks[8], (d_ff, d_model)),
        "ff2_b": w(ks[9], (d_model,)),
        "ln2_g": jnp.ones((d_model,), jnp.float32),
        "ln2_b": jnp.zeros((d_model,), jnp.float32),
        "cls_w": w(ks[10], (d_model, n_classes)),
        "cls_b": w(ks[11], (n_classes,)),
    }


# ----------------------------------------------------------------------------
# Forward pass (mirrors TransformerEncoder.forward exactly, eval mode)
# ----------------------------------------------------------------------------

def transformer_encoder_forward(params, x, *, nhead):
    B, S, F = x.shape
    D = params["emb_w"].shape[1]
    H = nhead
    hd = D // H
    NC = params["cls_w"].shape[1]
    L, N = B, S          # batch_first=False: dim0 is the attention sequence axis

    pe = positional_encoding(D)[:, :S]                               # (1, S, D)
    pe_slab = jnp.broadcast_to(pe, (B, S, D)).reshape(B * S, D)

    # split the packed in_proj weight/bias (free at trace time)
    wq = params["in_proj_w"][:, :D]
    wk = params["in_proj_w"][:, D:2 * D]
    wv = params["in_proj_w"][:, 2 * D:]
    bq = params["in_proj_b"][:D].reshape(1, D)
    bk = params["in_proj_b"][D:2 * D].reshape(1, D)
    bv = params["in_proj_b"][2 * D:].reshape(1, D)

    # constant head group-sum / broadcast matrices and mean-pooling matrix
    head_of = jnp.arange(D, dtype=jnp.int32) // hd
    g = (head_of[:, None] == jnp.arange(H, dtype=jnp.int32)[None, :]
         ).astype(jnp.float32)                                       # (D, H)
    gt = g.T                                                         # (H, D)
    pool = ((jnp.arange(B, dtype=jnp.int32)[:, None]
             == (jnp.arange(B * S, dtype=jnp.int32) // S)[None, :])
            .astype(jnp.float32) / S)                                # (B, B*S)

    args = [
        x.reshape(B * S, F).astype(jnp.float32), pe_slab,
        params["emb_w"], params["emb_b"].reshape(1, D),
        wq, wk, wv, bq, bk, bv,
        params["out_proj_w"], params["out_proj_b"].reshape(1, D),
        params["ln1_g"].reshape(1, D), params["ln1_b"].reshape(1, D),
        params["ff1_w"], params["ff1_b"].reshape(1, -1),
        params["ff2_w"], params["ff2_b"].reshape(1, D),
        params["ln2_g"].reshape(1, D), params["ln2_b"].reshape(1, D),
        params["cls_w"], params["cls_b"].reshape(1, NC),
        g, gt, pool,
    ]

    def full(shape):
        return pl.BlockSpec(shape, lambda *_: (0,) * len(shape))

    kernel = functools.partial(_fused_forward_kernel,
                               L=L, N=N, head_dim=hd, eps=1e-5)

    pooled, logits = pl.pallas_call(
        kernel,
        out_shape=(jax.ShapeDtypeStruct((B, D), jnp.float32),
                   jax.ShapeDtypeStruct((B, NC), jnp.float32)),
        grid=(1,),
        in_specs=[full(a.shape) for a in args],
        out_specs=(full((B, D)), full((B, NC))),
        compiler_params=pltpu.CompilerParams(
            dimension_semantics=("arbitrary",)),
    )(*args)
    return pooled, logits


# ----------------------------------------------------------------------------

if __name__ == "__main__":
    B, S, F = 2, 8, 16                 # batch, seq, n_features
    D, H, NC, DFF = 32, 16, 64, 2048   # d_model, nhead, n_classes, dim_feedforward

    key = jax.random.PRNGKey(0)
    kx, kp = jax.random.split(key)
    x = jax.random.normal(kx, (B, S, F), dtype=jnp.float32)
    params = init_params(kp, F, D, DFF, NC)

    fwd = jax.jit(functools.partial(transformer_encoder_forward, nhead=H))
    pooled, logits = fwd(params, x)
    jax.block_until_ready((pooled, logits))

    assert pooled.shape == (B, D), pooled.shape
    assert logits.shape == (B, NC), logits.shape
    assert bool(jnp.all(jnp.isfinite(pooled))) and bool(jnp.all(jnp.isfinite(logits)))
    print("KERNEL_OK")
</pallas_src>

<mosaic_0001>
module attributes {stable_mosaic.version = 11 : i64} {
  func.func @_fused_forward_kernel(%arg0: i32, %arg1: memref<16x16xf32, #tpu.memory_space<vmem>>, %arg2: memref<16x32xf32, #tpu.memory_space<vmem>>, %arg3: memref<16x32xf32, #tpu.memory_space<vmem>>, %arg4: memref<1x32xf32, #tpu.memory_space<vmem>>, %arg5: memref<32x32xf32, #tpu.memory_space<vmem>>, %arg6: memref<32x32xf32, #tpu.memory_space<vmem>>, %arg7: memref<32x32xf32, #tpu.memory_space<vmem>>, %arg8: memref<1x32xf32, #tpu.memory_space<vmem>>, %arg9: memref<1x32xf32, #tpu.memory_space<vmem>>, %arg10: memref<1x32xf32, #tpu.memory_space<vmem>>, %arg11: memref<32x32xf32, #tpu.memory_space<vmem>>, %arg12: memref<1x32xf32, #tpu.memory_space<vmem>>, %arg13: memref<1x32xf32, #tpu.memory_space<vmem>>, %arg14: memref<1x32xf32, #tpu.memory_space<vmem>>, %arg15: memref<32x2048xf32, #tpu.memory_space<vmem>>, %arg16: memref<1x2048xf32, #tpu.memory_space<vmem>>, %arg17: memref<2048x32xf32, #tpu.memory_space<vmem>>, %arg18: memref<1x32xf32, #tpu.memory_space<vmem>>, %arg19: memref<1x32xf32, #tpu.memory_space<vmem>>, %arg20: memref<1x32xf32, #tpu.memory_space<vmem>>, %arg21: memref<32x64xf32, #tpu.memory_space<vmem>>, %arg22: memref<1x64xf32, #tpu.memory_space<vmem>>, %arg23: memref<32x16xf32, #tpu.memory_space<vmem>>, %arg24: memref<16x32xf32, #tpu.memory_space<vmem>>, %arg25: memref<2x16xf32, #tpu.memory_space<vmem>>, %arg26: memref<2x32xf32, #tpu.memory_space<vmem>>, %arg27: memref<2x64xf32, #tpu.memory_space<vmem>>) attributes {dimension_semantics = [#tpu.dimension_semantics<arbitrary>], iteration_bounds = array<i64: 1>, scalar_prefetch = 0 : i64, scratch_operands = 0 : i64, tpu.core_type = #tpu.core_type<tc>, window_params = [{pipeline_mode = #tpu.pipeline_mode<synchronous>, transform_indices = @transform_0, window_bounds = array<i64: 16, 16>}, {pipeline_mode = #tpu.pipeline_mode<synchronous>, transform_indices = @transform_1, window_bounds = array<i64: 16, 32>}, {pipeline_mode = #tpu.pipeline_mode<synchronous>, transform_indices = @transform_2, window_bounds = array<i64: 16, 32>}, {pipeline_mode = #tpu.pipeline_mode<synchronous>, transform_indices = @transform_3, window_bounds = array<i64: 1, 32>}, {pipeline_mode = #tpu.pipeline_mode<synchronous>, transform_indices = @transform_4, window_bounds = array<i64: 32, 32>}, {pipeline_mode = #tpu.pipeline_mode<synchronous>, transform_indices = @transform_5, window_bounds = array<i64: 32, 32>}, {pipeline_mode = #tpu.pipeline_mode<synchronous>, transform_indices = @transform_6, window_bounds = array<i64: 32, 32>}, {pipeline_mode = #tpu.pipeline_mode<synchronous>, transform_indices = @transform_7, window_bounds = array<i64: 1, 32>}, {pipeline_mode = #tpu.pipeline_mode<synchronous>, transform_indices = @transform_8, window_bounds = array<i64: 1, 32>}, {pipeline_mode = #tpu.pipeline_mode<synchronous>, transform_indices = @transform_9, window_bounds = array<i64: 1, 32>}, {pipeline_mode = #tpu.pipeline_mode<synchronous>, transform_indices = @transform_10, window_bounds = array<i64: 32, 32>}, {pipeline_mode = #tpu.pipeline_mode<synchronous>, transform_indices = @transform_11, window_bounds = array<i64: 1, 32>}, {pipeline_mode = #tpu.pipeline_mode<synchronous>, transform_indices = @transform_12, window_bounds = array<i64: 1, 32>}, {pipeline_mode = #tpu.pipeline_mode<synchronous>, transform_indices = @transform_13, window_bounds = array<i64: 1, 32>}, {pipeline_mode = #tpu.pipeline_mode<synchronous>, transform_indices = @transform_14, window_bounds = array<i64: 32, 2048>}, {pipeline_mode = #tpu.pipeline_mode<synchronous>, transform_indices = @transform_15, window_bounds = array<i64: 1, 2048>}, {pipeline_mode = #tpu.pipeline_mode<synchronous>, transform_indices = @transform_16, window_bounds = array<i64: 2048, 32>}, {pipeline_mode = #tpu.pipeline_mode<synchronous>, transform_indices = @transform_17, window_bounds = array<i64: 1, 32>}, {pipeline_mode = #tpu.pipeline_mode<synchronous>, transform_indices = @transform_18, window_bounds = array<i64: 1, 32>}, {pipeline_mode = #tpu.pipeline_mode<synchronous>, transform_indices = @transform_19, window_bounds = array<i64: 1, 32>}, {pipeline_mode = #tpu.pipeline_mode<synchronous>, transform_indices = @transform_20, window_bounds = array<i64: 32, 64>}, {pipeline_mode = #tpu.pipeline_mode<synchronous>, transform_indices = @transform_21, window_bounds = array<i64: 1, 64>}, {pipeline_mode = #tpu.pipeline_mode<synchronous>, transform_indices = @transform_22, window_bounds = array<i64: 32, 16>}, {pipeline_mode = #tpu.pipeline_mode<synchronous>, transform_indices = @transform_23, window_bounds = array<i64: 16, 32>}, {pipeline_mode = #tpu.pipeline_mode<synchronous>, transform_indices = @transform_24, window_bounds = array<i64: 2, 16>}, {pipeline_mode = #tpu.pipeline_mode<synchronous>, transform_indices = @transform_25, window_bounds = array<i64: 2, 32>}, {pipeline_mode = #tpu.pipeline_mode<synchronous>, transform_indices = @transform_26, window_bounds = array<i64: 2, 64>}]} {
    %c0 = arith.constant 0 : index
    %c0_0 = arith.constant 0 : index
    %0 = vector.load %arg1[%c0, %c0_0] : memref<16x16xf32, #tpu.memory_space<vmem>>, vector<16x16xf32>
    %c0_1 = arith.constant 0 : index
    %c0_2 = arith.constant 0 : index
    %1 = vector.load %arg3[%c0_1, %c0_2] : memref<16x32xf32, #tpu.memory_space<vmem>>, vector<16x32xf32>
    %cst = arith.constant dense<0.000000e+00> : vector<16x32xf32>
    %2 = tpu.matmul %0, %1, %cst {dimension_numbers = #tpu.dot_dimension_numbers<[1], [0], [0], [1], [0, 0, 1, 1], [], []>} : vector<16x16xf32>, vector<16x32xf32>, vector<16x32xf32> -> vector<16x32xf32>
    %c0_3 = arith.constant 0 : index
    %c0_4 = arith.constant 0 : index
    %3 = vector.load %arg4[%c0_3, %c0_4] : memref<1x32xf32, #tpu.memory_space<vmem>>, vector<1x32xf32>
    %4 = vector.broadcast %3 : vector<1x32xf32> to vector<16x32xf32>
    %5 = arith.addf %2, %4 : vector<16x32xf32>
    %c0_5 = arith.constant 0 : index
    %c0_6 = arith.constant 0 : index
    %6 = vector.load %arg2[%c0_5, %c0_6] : memref<16x32xf32, #tpu.memory_space<vmem>>, vector<16x32xf32>
    %7 = arith.addf %5, %6 : vector<16x32xf32>
    %c0_7 = arith.constant 0 : index
    %c0_8 = arith.constant 0 : index
    %8 = vector.load %arg5[%c0_7, %c0_8] : memref<32x32xf32, #tpu.memory_space<vmem>>, vector<32x32xf32>
    %cst_9 = arith.constant dense<0.000000e+00> : vector<16x32xf32>
    %9 = tpu.matmul %7, %8, %cst_9 {dimension_numbers = #tpu.dot_dimension_numbers<[1], [0], [0], [1], [0, 0, 1, 1], [], []>} : vector<16x32xf32>, vector<32x32xf32>, vector<16x32xf32> -> vector<16x32xf32>
    %c0_10 = arith.constant 0 : index
    %c0_11 = arith.constant 0 : index
    %10 = vector.load %arg8[%c0_10, %c0_11] : memref<1x32xf32, #tpu.memory_space<vmem>>, vector<1x32xf32>
    %11 = vector.broadcast %10 : vector<1x32xf32> to vector<16x32xf32>
    %12 = arith.addf %9, %11 : vector<16x32xf32>
    %c0_12 = arith.constant 0 : index
    %c0_13 = arith.constant 0 : index
    %13 = vector.load %arg6[%c0_12, %c0_13] : memref<32x32xf32, #tpu.memory_space<vmem>>, vector<32x32xf32>
    %cst_14 = arith.constant dense<0.000000e+00> : vector<16x32xf32>
    %14 = tpu.matmul %7, %13, %cst_14 {dimension_numbers = #tpu.dot_dimension_numbers<[1], [0], [0], [1], [0, 0, 1, 1], [], []>} : vector<16x32xf32>, vector<32x32xf32>, vector<16x32xf32> -> vector<16x32xf32>
    %c0_15 = arith.constant 0 : index
    %c0_16 = arith.constant 0 : index
    %15 = vector.load %arg9[%c0_15, %c0_16] : memref<1x32xf32, #tpu.memory_space<vmem>>, vector<1x32xf32>
    %16 = vector.broadcast %15 : vector<1x32xf32> to vector<16x32xf32>
    %17 = arith.addf %14, %16 : vector<16x32xf32>
    %c0_17 = arith.constant 0 : index
    %c0_18 = arith.constant 0 : index
    %18 = vector.load %arg7[%c0_17, %c0_18] : memref<32x32xf32, #tpu.memory_space<vmem>>, vector<32x32xf32>
    %cst_19 = arith.constant dense<0.000000e+00> : vector<16x32xf32>
    %19 = tpu.matmul %7, %18, %cst_19 {dimension_numbers = #tpu.dot_dimension_numbers<[1], [0], [0], [1], [0, 0, 1, 1], [], []>} : vector<16x32xf32>, vector<32x32xf32>, vector<16x32xf32> -> vector<16x32xf32>
    %c0_20 = arith.constant 0 : index
    %c0_21 = arith.constant 0 : index
    %20 = vector.load %arg10[%c0_20, %c0_21] : memref<1x32xf32, #tpu.memory_space<vmem>>, vector<1x32xf32>
    %21 = vector.broadcast %20 : vector<1x32xf32> to vector<16x32xf32>
    %22 = arith.addf %19, %21 : vector<16x32xf32>
    %c0_22 = arith.constant 0 : index
    %c0_23 = arith.constant 0 : index
    %23 = vector.load %arg23[%c0_22, %c0_23] : memref<32x16xf32, #tpu.memory_space<vmem>>, vector<32x16xf32>
    %c0_24 = arith.constant 0 : index
    %c0_25 = arith.constant 0 : index
    %24 = vector.load %arg24[%c0_24, %c0_25] : memref<16x32xf32, #tpu.memory_space<vmem>>, vector<16x32xf32>
    %25 = vector.extract_strided_slice %12 {offsets = [0, 0], sizes = [8, 32], strides = [1, 1]} : vector<16x32xf32> to vector<8x32xf32>
    %26 = vector.extract_strided_slice %12 {offsets = [8, 0], sizes = [8, 32], strides = [1, 1]} : vector<16x32xf32> to vector<8x32xf32>
    %27 = vector.extract_strided_slice %17 {offsets = [0, 0], sizes = [8, 32], strides = [1, 1]} : vector<16x32xf32> to vector<8x32xf32>
    %28 = vector.extract_strided_slice %17 {offsets = [8, 0], sizes = [8, 32], strides = [1, 1]} : vector<16x32xf32> to vector<8x32xf32>
    %29 = vector.extract_strided_slice %22 {offsets = [0, 0], sizes = [8, 32], strides = [1, 1]} : vector<16x32xf32> to vector<8x32xf32>
    %30 = vector.extract_strided_slice %22 {offsets = [8, 0], sizes = [8, 32], strides = [1, 1]} : vector<16x32xf32> to vector<8x32xf32>
    %31 = arith.mulf %25, %27 : vector<8x32xf32>
    %cst_26 = arith.constant dense<0.000000e+00> : vector<8x16xf32>
    %32 = tpu.matmul %31, %23, %cst_26 {dimension_numbers = #tpu.dot_dimension_numbers<[1], [0], [0], [1], [0, 0, 1, 1], [], []>} : vector<8x32xf32>, vector<32x16xf32>, vector<8x16xf32> -> vector<8x16xf32>
    %cst_27 = arith.constant 0.707106769 : f32
    %33 = vector.broadcast %cst_27 : f32 to vector<8x16xf32>
    %34 = arith.mulf %32, %33 : vector<8x16xf32>
    %35 = arith.mulf %25, %28 : vector<8x32xf32>
    %cst_28 = arith.constant dense<0.000000e+00> : vector<8x16xf32>
    %36 = tpu.matmul %35, %23, %cst_28 {dimension_numbers = #tpu.dot_dimension_numbers<[1], [0], [0], [1], [0, 0, 1, 1], [], []>} : vector<8x32xf32>, vector<32x16xf32>, vector<8x16xf32> -> vector<8x16xf32>
    %cst_29 = arith.constant 0.707106769 : f32
    %37 = vector.broadcast %cst_29 : f32 to vector<8x16xf32>
    %38 = arith.mulf %36, %37 : vector<8x16xf32>
    %39 = arith.maximumf %34, %38 : vector<8x16xf32>
    %40 = arith.subf %34, %39 : vector<8x16xf32>
    %41 = math.exp %40 : vector<8x16xf32>
    %42 = arith.subf %38, %39 : vector<8x16xf32>
    %43 = math.exp %42 : vector<8x16xf32>
    %44 = arith.addf %41, %43 : vector<8x16xf32>
    %cst_30 = arith.constant 1.000000e+00 : f32
    %45 = vector.broadcast %cst_30 : f32 to vector<8x16xf32>
    %46 = arith.divf %45, %44 : vector<8x16xf32>
    %47 = arith.mulf %41, %46 : vector<8x16xf32>
    %cst_31 = arith.constant dense<0.000000e+00> : vector<8x32xf32>
    %48 = tpu.matmul %47, %24, %cst_31 {dimension_numbers = #tpu.dot_dimension_numbers<[1], [0], [0], [1], [0, 0, 1, 1], [], []>} : vector<8x16xf32>, vector<16x32xf32>, vector<8x32xf32> -> vector<8x32xf32>
    %49 = arith.mulf %48, %29 : vector<8x32xf32>
    %50 = arith.mulf %43, %46 : vector<8x16xf32>
    %cst_32 = arith.constant dense<0.000000e+00> : vector<8x32xf32>
    %51 = tpu.matmul %50, %24, %cst_32 {dimension_numbers = #tpu.dot_dimension_numbers<[1], [0], [0], [1], [0, 0, 1, 1], [], []>} : vector<8x16xf32>, vector<16x32xf32>, vector<8x32xf32> -> vector<8x32xf32>
    %52 = arith.mulf %51, %30 : vector<8x32xf32>
    %53 = arith.addf %49, %52 : vector<8x32xf32>
    %54 = arith.mulf %26, %27 : vector<8x32xf32>
    %cst_33 = arith.constant dense<0.000000e+00> : vector<8x16xf32>
    %55 = tpu.matmul %54, %23, %cst_33 {dimension_numbers = #tpu.dot_dimension_numbers<[1], [0], [0], [1], [0, 0, 1, 1], [], []>} : vector<8x32xf32>, vector<32x16xf32>, vector<8x16xf32> -> vector<8x16xf32>
    %cst_34 = arith.constant 0.707106769 : f32
    %56 = vector.broadcast %cst_34 : f32 to vector<8x16xf32>
    %57 = arith.mulf %55, %56 : vector<8x16xf32>
    %58 = arith.mulf %26, %28 : vector<8x32xf32>
    %cst_35 = arith.constant dense<0.000000e+00> : vector<8x16xf32>
    %59 = tpu.matmul %58, %23, %cst_35 {dimension_numbers = #tpu.dot_dimension_numbers<[1], [0], [0], [1], [0, 0, 1, 1], [], []>} : vector<8x32xf32>, vector<32x16xf32>, vector<8x16xf32> -> vector<8x16xf32>
    %cst_36 = arith.constant 0.707106769 : f32
    %60 = vector.broadcast %cst_36 : f32 to vector<8x16xf32>
    %61 = arith.mulf %59, %60 : vector<8x16xf32>
    %62 = arith.maximumf %57, %61 : vector<8x16xf32>
    %63 = arith.subf %57, %62 : vector<8x16xf32>
    %64 = math.exp %63 : vector<8x16xf32>
    %65 = arith.subf %61, %62 : vector<8x16xf32>
    %66 = math.exp %65 : vector<8x16xf32>
    %67 = arith.addf %64, %66 : vector<8x16xf32>
    %cst_37 = arith.constant 1.000000e+00 : f32
    %68 = vector.broadcast %cst_37 : f32 to vector<8x16xf32>
    %69 = arith.divf %68, %67 : vector<8x16xf32>
    %70 = arith.mulf %64, %69 : vector<8x16xf32>
    %cst_38 = arith.constant dense<0.000000e+00> : vector<8x32xf32>
    %71 = tpu.matmul %70, %24, %cst_38 {dimension_numbers = #tpu.dot_dimension_numbers<[1], [0], [0], [1], [0, 0, 1, 1], [], []>} : vector<8x16xf32>, vector<16x32xf32>, vector<8x32xf32> -> vector<8x32xf32>
    %72 = arith.mulf %71, %29 : vector<8x32xf32>
    %73 = arith.mulf %66, %69 : vector<8x16xf32>
    %cst_39 = arith.constant dense<0.000000e+00> : vector<8x32xf32>
    %74 = tpu.matmul %73, %24, %cst_39 {dimension_numbers = #tpu.dot_dimension_numbers<[1], [0], [0], [1], [0, 0, 1, 1], [], []>} : vector<8x16xf32>, vector<16x32xf32>, vector<8x32xf32> -> vector<8x32xf32>
    %75 = arith.mulf %74, %30 : vector<8x32xf32>
    %76 = arith.addf %72, %75 : vector<8x32xf32>
    %77 = tpu.concatenate %53, %76 in 0 : vector<8x32xf32>, vector<8x32xf32> -> vector<16x32xf32>
    %c0_40 = arith.constant 0 : index
    %c0_41 = arith.constant 0 : index
    %78 = vector.load %arg11[%c0_40, %c0_41] : memref<32x32xf32, #tpu.memory_space<vmem>>, vector<32x32xf32>
    %cst_42 = arith.constant dense<0.000000e+00> : vector<16x32xf32>
    %79 = tpu.matmul %77, %78, %cst_42 {dimension_numbers = #tpu.dot_dimension_numbers<[1], [0], [0], [1], [0, 0, 1, 1], [], []>} : vector<16x32xf32>, vector<32x32xf32>, vector<16x32xf32> -> vector<16x32xf32>
    %c0_43 = arith.constant 0 : index
    %c0_44 = arith.constant 0 : index
    %80 = vector.load %arg12[%c0_43, %c0_44] : memref<1x32xf32, #tpu.memory_space<vmem>>, vector<1x32xf32>
    %81 = vector.broadcast %80 : vector<1x32xf32> to vector<16x32xf32>
    %82 = arith.addf %79, %81 : vector<16x32xf32>
    %83 = arith.addf %7, %82 : vector<16x32xf32>
    %cst_45 = arith.constant dense<0.000000e+00> : vector<16xf32>
    %84 = vector.multi_reduction <add>, %83, %cst_45 [1] : vector<16x32xf32> to vector<16xf32>
    %85 = vector.shape_cast %84 : vector<16xf32> to vector<16x1xf32>
    %cst_46 = arith.constant 3.200000e+01 : f32
    %86 = vector.broadcast %cst_46 : f32 to vector<16x1xf32>
    %87 = arith.divf %85, %86 : vector<16x1xf32>
    %88 = vector.broadcast %87 : vector<16x1xf32> to vector<16x32xf32>
    %89 = arith.subf %83, %88 : vector<16x32xf32>
    %90 = arith.mulf %89, %89 : vector<16x32xf32>
    %cst_47 = arith.constant dense<0.000000e+00> : vector<16xf32>
    %91 = vector.multi_reduction <add>, %90, %cst_47 [1] : vector<16x32xf32> to vector<16xf32>
    %92 = vector.shape_cast %91 : vector<16xf32> to vector<16x1xf32>
    %cst_48 = arith.constant 3.200000e+01 : f32
    %93 = vector.broadcast %cst_48 : f32 to vector<16x1xf32>
    %94 = arith.divf %92, %93 : vector<16x1xf32>
    %95 = vector.broadcast %87 : vector<16x1xf32> to vector<16x32xf32>
    %96 = arith.subf %83, %95 : vector<16x32xf32>
    %cst_49 = arith.constant 9.99999974E-6 : f32
    %97 = vector.broadcast %cst_49 : f32 to vector<16x1xf32>
    %98 = arith.addf %94, %97 : vector<16x1xf32>
    %99 = math.rsqrt %98 : vector<16x1xf32>
    %100 = vector.broadcast %99 : vector<16x1xf32> to vector<16x32xf32>
    %101 = arith.mulf %96, %100 : vector<16x32xf32>
    %c0_50 = arith.constant 0 : index
    %c0_51 = arith.constant 0 : index
    %102 = vector.load %arg13[%c0_50, %c0_51] : memref<1x32xf32, #tpu.memory_space<vmem>>, vector<1x32xf32>
    %103 = vector.broadcast %102 : vector<1x32xf32> to vector<16x32xf32>
    %104 = arith.mulf %101, %103 : vector<16x32xf32>
    %c0_52 = arith.constant 0 : index
    %c0_53 = arith.constant 0 : index
    %105 = vector.load %arg14[%c0_52, %c0_53] : memref<1x32xf32, #tpu.memory_space<vmem>>, vector<1x32xf32>
    %106 = vector.broadcast %105 : vector<1x32xf32> to vector<16x32xf32>
    %107 = arith.addf %104, %106 : vector<16x32xf32>
    %c0_54 = arith.constant 0 : index
    %c0_55 = arith.constant 0 : index
    %108 = vector.load %arg15[%c0_54, %c0_55] : memref<32x2048xf32, #tpu.memory_space<vmem>>, vector<32x2048xf32>
    %cst_56 = arith.constant dense<0.000000e+00> : vector<16x2048xf32>
    %109 = tpu.matmul %107, %108, %cst_56 {dimension_numbers = #tpu.dot_dimension_numbers<[1], [0], [0], [1], [0, 0, 1, 1], [], []>} : vector<16x32xf32>, vector<32x2048xf32>, vector<16x2048xf32> -> vector<16x2048xf32>
    %c0_57 = arith.constant 0 : index
    %c0_58 = arith.constant 0 : index
    %110 = vector.load %arg16[%c0_57, %c0_58] : memref<1x2048xf32, #tpu.memory_space<vmem>>, vector<1x2048xf32>
    %111 = vector.broadcast %110 : vector<1x2048xf32> to vector<16x2048xf32>
    %112 = arith.addf %109, %111 : vector<16x2048xf32>
    %cst_59 = arith.constant 0.000000e+00 : f32
    %113 = vector.broadcast %cst_59 : f32 to vector<16x2048xf32>
    %114 = arith.maximumf %112, %113 : vector<16x2048xf32>
    %c0_60 = arith.constant 0 : index
    %c0_61 = arith.constant 0 : index
    %115 = vector.load %arg17[%c0_60, %c0_61] : memref<2048x32xf32, #tpu.memory_space<vmem>>, vector<2048x32xf32>
    %cst_62 = arith.constant dense<0.000000e+00> : vector<16x32xf32>
    %116 = tpu.matmul %114, %115, %cst_62 {dimension_numbers = #tpu.dot_dimension_numbers<[1], [0], [0], [1], [0, 0, 1, 1], [], []>} : vector<16x2048xf32>, vector<2048x32xf32>, vector<16x32xf32> -> vector<16x32xf32>
    %c0_63 = arith.constant 0 : index
    %c0_64 = arith.constant 0 : index
    %117 = vector.load %arg18[%c0_63, %c0_64] : memref<1x32xf32, #tpu.memory_space<vmem>>, vector<1x32xf32>
    %118 = vector.broadcast %117 : vector<1x32xf32> to vector<16x32xf32>
    %119 = arith.addf %116, %118 : vector<16x32xf32>
    %120 = arith.addf %107, %119 : vector<16x32xf32>
    %cst_65 = arith.constant dense<0.000000e+00> : vector<16xf32>
    %121 = vector.multi_reduction <add>, %120, %cst_65 [1] : vector<16x32xf32> to vector<16xf32>
    %122 = vector.shape_cast %121 : vector<16xf32> to vector<16x1xf32>
    %cst_66 = arith.constant 3.200000e+01 : f32
    %123 = vector.broadcast %cst_66 : f32 to vector<16x1xf32>
    %124 = arith.divf %122, %123 : vector<16x1xf32>
    %125 = vector.broadcast %124 : vector<16x1xf32> to vector<16x32xf32>
    %126 = arith.subf %120, %125 : vector<16x32xf32>
    %127 = arith.mulf %126, %126 : vector<16x32xf32>
    %cst_67 = arith.constant dense<0.000000e+00> : vector<16xf32>
    %128 = vector.multi_reduction <add>, %127, %cst_67 [1] : vector<16x32xf32> to vector<16xf32>
    %129 = vector.shape_cast %128 : vector<16xf32> to vector<16x1xf32>
    %cst_68 = arith.constant 3.200000e+01 : f32
    %130 = vector.broadcast %cst_68 : f32 to vector<16x1xf32>
    %131 = arith.divf %129, %130 : vector<16x1xf32>
    %132 = vector.broadcast %124 : vector<16x1xf32> to vector<16x32xf32>
    %133 = arith.subf %120, %132 : vector<16x32xf32>
    %cst_69 = arith.constant 9.99999974E-6 : f32
    %134 = vector.broadcast %cst_69 : f32 to vector<16x1xf32>
    %135 = arith.addf %131, %134 : vector<16x1xf32>
    %136 = math.rsqrt %135 : vector<16x1xf32>
    %137 = vector.broadcast %136 : vector<16x1xf32> to vector<16x32xf32>
    %138 = arith.mulf %133, %137 : vector<16x32xf32>
    %c0_70 = arith.constant 0 : index
    %c0_71 = arith.constant 0 : index
    %139 = vector.load %arg19[%c0_70, %c0_71] : memref<1x32xf32, #tpu.memory_space<vmem>>, vector<1x32xf32>
    %140 = vector.broadcast %139 : vector<1x32xf32> to vector<16x32xf32>
    %141 = arith.mulf %138, %140 : vector<16x32xf32>
    %c0_72 = arith.constant 0 : index
    %c0_73 = arith.constant 0 : index
    %142 = vector.load %arg20[%c0_72, %c0_73] : memref<1x32xf32, #tpu.memory_space<vmem>>, vector<1x32xf32>
    %143 = vector.broadcast %142 : vector<1x32xf32> to vector<16x32xf32>
    %144 = arith.addf %141, %143 : vector<16x32xf32>
    %c0_74 = arith.constant 0 : index
    %c0_75 = arith.constant 0 : index
    %145 = vector.load %arg25[%c0_74, %c0_75] : memref<2x16xf32, #tpu.memory_space<vmem>>, vector<2x16xf32>
    %cst_76 = arith.constant dense<0.000000e+00> : vector<2x32xf32>
    %146 = tpu.matmul %145, %144, %cst_76 {dimension_numbers = #tpu.dot_dimension_numbers<[1], [0], [0], [1], [0, 0, 1, 1], [], []>} : vector<2x16xf32>, vector<16x32xf32>, vector<2x32xf32> -> vector<2x32xf32>
    %c0_77 = arith.constant 0 : index
    %c0_78 = arith.constant 0 : index
    %147 = vector.load %arg21[%c0_77, %c0_78] : memref<32x64xf32, #tpu.memory_space<vmem>>, vector<32x64xf32>
    %cst_79 = arith.constant dense<0.000000e+00> : vector<2x64xf32>
    %148 = tpu.matmul %146, %147, %cst_79 {dimension_numbers = #tpu.dot_dimension_numbers<[1], [0], [0], [1], [0, 0, 1, 1], [], []>} : vector<2x32xf32>, vector<32x64xf32>, vector<2x64xf32> -> vector<2x64xf32>
    %c0_80 = arith.constant 0 : index
    %c0_81 = arith.constant 0 : index
    %149 = vector.load %arg22[%c0_80, %c0_81] : memref<1x64xf32, #tpu.memory_space<vmem>>, vector<1x64xf32>
    %150 = vector.broadcast %149 : vector<1x64xf32> to vector<2x64xf32>
    %151 = arith.addf %148, %150 : vector<2x64xf32>
    %c0_82 = arith.constant 0 : index
    %c0_83 = arith.constant 0 : index
    %152 = vector.load %arg26[%c0_82, %c0_83] : memref<2x32xf32, #tpu.memory_space<vmem>>, vector<2x32xf32>
    tpu.vector_store %arg26[%c0_82, %c0_83], %146 {strides = array<i32>} : memref<2x32xf32, #tpu.memory_space<vmem>>, vector<2x32xf32>,
    %c0_84 = arith.constant 0 : index
    %c0_85 = arith.constant 0 : index
    %153 = vector.load %arg27[%c0_84, %c0_85] : memref<2x64xf32, #tpu.memory_space<vmem>>, vector<2x64xf32>
    tpu.vector_store %arg27[%c0_84, %c0_85], %151 {strides = array<i32>} : memref<2x64xf32, #tpu.memory_space<vmem>>, vector<2x64xf32>,
    return
  }
  func.func @transform_0(%arg0: i32) -> (i32, i32) {
    %c0_i32 = arith.constant 0 : i32
    %c0_i32_0 = arith.constant 0 : i32
    %c0_i32_1 = arith.constant 0 : i32
    return %c0_i32, %c0_i32_0 : i32, i32
  }
  func.func @transform_1(%arg0: i32) -> (i32, i32) {
    %c0_i32 = arith.constant 0 : i32
    %c0_i32_0 = arith.constant 0 : i32
    %c0_i32_1 = arith.constant 0 : i32
    return %c0_i32, %c0_i32_0 : i32, i32
  }
  func.func @transform_2(%arg0: i32) -> (i32, i32) {
    %c0_i32 = arith.constant 0 : i32
    %c0_i32_0 = arith.constant 0 : i32
    %c0_i32_1 = arith.constant 0 : i32
    return %c0_i32, %c0_i32_0 : i32, i32
  }
  func.func @transform_3(%arg0: i32) -> (i32, i32) {
    %c0_i32 = arith.constant 0 : i32
    %c0_i32_0 = arith.constant 0 : i32
    %c0_i32_1 = arith.constant 0 : i32
    return %c0_i32, %c0_i32_0 : i32, i32
  }
  func.func @transform_4(%arg0: i32) -> (i32, i32) {
    %c0_i32 = arith.constant 0 : i32
    %c0_i32_0 = arith.constant 0 : i32
    %c0_i32_1 = arith.constant 0 : i32
    return %c0_i32, %c0_i32_0 : i32, i32
  }
  func.func @transform_5(%arg0: i32) -> (i32, i32) {
    %c0_i32 = arith.constant 0 : i32
    %c0_i32_0 = arith.constant 0 : i32
    %c0_i32_1 = arith.constant 0 : i32
    return %c0_i32, %c0_i32_0 : i32, i32
  }
  func.func @transform_6(%arg0: i32) -> (i32, i32) {
    %c0_i32 = arith.constant 0 : i32
    %c0_i32_0 = arith.constant 0 : i32
    %c0_i32_1 = arith.constant 0 : i32
    return %c0_i32, %c0_i32_0 : i32, i32
  }
  func.func @transform_7(%arg0: i32) -> (i32, i32) {
    %c0_i32 = arith.constant 0 : i32
    %c0_i32_0 = arith.constant 0 : i32
    %c0_i32_1 = arith.constant 0 : i32
    return %c0_i32, %c0_i32_0 : i32, i32
  }
  func.func @transform_8(%arg0: i32) -> (i32, i32) {
    %c0_i32 = arith.constant 0 : i32
    %c0_i32_0 = arith.constant 0 : i32
    %c0_i32_1 = arith.constant 0 : i32
    return %c0_i32, %c0_i32_0 : i32, i32
  }
  func.func @transform_9(%arg0: i32) -> (i32, i32) {
    %c0_i32 = arith.constant 0 : i32
    %c0_i32_0 = arith.constant 0 : i32
    %c0_i32_1 = arith.constant 0 : i32
    return %c0_i32, %c0_i32_0 : i32, i32
  }
  func.func @transform_10(%arg0: i32) -> (i32, i32) {
    %c0_i32 = arith.constant 0 : i32
    %c0_i32_0 = arith.constant 0 : i32
    %c0_i32_1 = arith.constant 0 : i32
    return %c0_i32, %c0_i32_0 : i32, i32
  }
  func.func @transform_11(%arg0: i32) -> (i32, i32) {
    %c0_i32 = arith.constant 0 : i32
    %c0_i32_0 = arith.constant 0 : i32
    %c0_i32_1 = arith.constant 0 : i32
    return %c0_i32, %c0_i32_0 : i32, i32
  }
  func.func @transform_12(%arg0: i32) -> (i32, i32) {
    %c0_i32 = arith.constant 0 : i32
    %c0_i32_0 = arith.constant 0 : i32
    %c0_i32_1 = arith.constant 0 : i32
    return %c0_i32, %c0_i32_0 : i32, i32
  }
  func.func @transform_13(%arg0: i32) -> (i32, i32) {
    %c0_i32 = arith.constant 0 : i32
    %c0_i32_0 = arith.constant 0 : i32
    %c0_i32_1 = arith.constant 0 : i32
    return %c0_i32, %c0_i32_0 : i32, i32
  }
  func.func @transform_14(%arg0: i32) -> (i32, i32) {
    %c0_i32 = arith.constant 0 : i32
    %c0_i32_0 = arith.constant 0 : i32
    %c0_i32_1 = arith.constant 0 : i32
    return %c0_i32, %c0_i32_0 : i32, i32
  }
  func.func @transform_15(%arg0: i32) -> (i32, i32) {
    %c0_i32 = arith.constant 0 : i32
    %c0_i32_0 = arith.constant 0 : i32
    %c0_i32_1 = arith.constant 0 : i32
    return %c0_i32, %c0_i32_0 : i32, i32
  }
  func.func @transform_16(%arg0: i32) -> (i32, i32) {
    %c0_i32 = arith.constant 0 : i32
    %c0_i32_0 = arith.constant 0 : i32
    %c0_i32_1 = arith.constant 0 : i32
    return %c0_i32, %c0_i32_0 : i32, i32
  }
  func.func @transform_17(%arg0: i32) -> (i32, i32) {
    %c0_i32 = arith.constant 0 : i32
    %c0_i32_0 = arith.constant 0 : i32
    %c0_i32_1 = arith.constant 0 : i32
    return %c0_i32, %c0_i32_0 : i32, i32
  }
  func.func @transform_18(%arg0: i32) -> (i32, i32) {
    %c0_i32 = arith.constant 0 : i32
    %c0_i32_0 = arith.constant 0 : i32
    %c0_i32_1 = arith.constant 0 : i32
    return %c0_i32, %c0_i32_0 : i32, i32
  }
  func.func @transform_19(%arg0: i32) -> (i32, i32) {
    %c0_i32 = arith.constant 0 : i32
    %c0_i32_0 = arith.constant 0 : i32
    %c0_i32_1 = arith.constant 0 : i32
    return %c0_i32, %c0_i32_0 : i32, i32
  }
  func.func @transform_20(%arg0: i32) -> (i32, i32) {
    %c0_i32 = arith.constant 0 : i32
    %c0_i32_0 = arith.constant 0 : i32
    %c0_i32_1 = arith.constant 0 : i32
    return %c0_i32, %c0_i32_0 : i32, i32
  }
  func.func @transform_21(%arg0: i32) -> (i32, i32) {
    %c0_i32 = arith.constant 0 : i32
    %c0_i32_0 = arith.constant 0 : i32
    %c0_i32_1 = arith.constant 0 : i32
    return %c0_i32, %c0_i32_0 : i32, i32
  }
  func.func @transform_22(%arg0: i32) -> (i32, i32) {
    %c0_i32 = arith.constant 0 : i32
    %c0_i32_0 = arith.constant 0 : i32
    %c0_i32_1 = arith.constant 0 : i32
    return %c0_i32, %c0_i32_0 : i32, i32
  }
  func.func @transform_23(%arg0: i32) -> (i32, i32) {
    %c0_i32 = arith.constant 0 : i32
    %c0_i32_0 = arith.constant 0 : i32
    %c0_i32_1 = arith.constant 0 : i32
    return %c0_i32, %c0_i32_0 : i32, i32
  }
  func.func @transform_24(%arg0: i32) -> (i32, i32) {
    %c0_i32 = arith.constant 0 : i32
    %c0_i32_0 = arith.constant 0 : i32
    %c0_i32_1 = arith.constant 0 : i32
    return %c0_i32, %c0_i32_0 : i32, i32
  }
  func.func @transform_25(%arg0: i32) -> (i32, i32) {
    %c0_i32 = arith.constant 0 : i32
    %c0_i32_0 = arith.constant 0 : i32
    %c0_i32_1 = arith.constant 0 : i32
    return %c0_i32, %c0_i32_0 : i32, i32
  }
  func.func @transform_26(%arg0: i32) -> (i32, i32) {
    %c0_i32 = arith.constant 0 : i32
    %c0_i32_0 = arith.constant 0 : i32
    %c0_i32_1 = arith.constant 0 : i32
    return %c0_i32, %c0_i32_0 : i32, i32
  }
}

</mosaic_0001>

<bundles_post_ra>
// kernel: transformer_encoder_forward.1
= control target key start
LH: loop header
LB: loop body
LE: loop exit
PB: predicated region body
PF: predicated region fallthrough
CT: control target
= control target key end

     0   :  { %s3431_s0 = inlined_call_operand.vmem [shape: f32[16,16], index: 0, kind: input, shape index: {}]   ;;  %s3432_s1 = inlined_call_operand.vmem [shape: f32[16,32], index: 1, kind: input, shape index: {}]   ;;  %s3433_s2 = inlined_call_operand.vmem [shape: f32[16,32], index: 2, kind: input, shape index: {}]   ;;  %s3434_s3 = inlined_call_operand.vmem [shape: f32[1,32], index: 3, kind: input, shape index: {}]   ;;  %s3435_s4 = inlined_call_operand.vmem [shape: f32[32,32], index: 4, kind: input, shape index: {}]   ;;  %s3436_s5 = inlined_call_operand.vmem [shape: f32[32,32], index: 5, kind: input, shape index: {}]   ;;  %s3437_s6 = inlined_call_operand.vmem [shape: f32[32,32], index: 6, kind: input, shape index: {}]   ;;  %s3438_s7 = inlined_call_operand.vmem [shape: f32[1,32], index: 7, kind: input, shape index: {}]   ;;  %s3439_s8 = inlined_call_operand.vmem [shape: f32[1,32], index: 8, kind: input, shape index: {}]   ;;  %s3440_s9 = inlined_call_operand.vmem [shape: f32[1,32], index: 9, kind: input, shape index: {}]   ;;  %s3441_s10 = inlined_call_operand.vmem [shape: f32[32,32], index: 10, kind: input, shape index: {}]   ;;  %s3442_s11 = inlined_call_operand.vmem [shape: f32[1,32], index: 11, kind: input, shape index: {}]   ;;  %s3443_s12 = inlined_call_operand.vmem [shape: f32[1,32], index: 12, kind: input, shape index: {}]   ;;  %s3444_s13 = inlined_call_operand.vmem [shape: f32[1,32], index: 13, kind: input, shape index: {}]   ;;  %s3445_s14 = inlined_call_operand.vmem [shape: f32[32,2048], index: 14, kind: input, shape index: {}]   ;;  %s3446_s15 = inlined_call_operand.vmem [shape: f32[1,2048], index: 15, kind: input, shape index: {}]   ;;  %s3447_s16 = inlined_call_operand.vmem [shape: f32[2048,32], index: 16, kind: input, shape index: {}]   ;;  %s3448_s17 = inlined_call_operand.vmem [shape: f32[1,32], index: 17, kind: input, shape index: {}]   ;;  %s3449_s18 = inlined_call_operand.vmem [shape: f32[1,32], index: 18, kind: input, shape index: {}]   ;;  %s3450_s19 = inlined_call_operand.vmem [shape: f32[1,32], index: 19, kind: input, shape index: {}]   ;;  %s3451_s20 = inlined_call_operand.vmem [shape: f32[32,64], index: 20, kind: input, shape index: {}]   ;;  %s3452_s21 = inlined_call_operand.vmem [shape: f32[1,64], index: 21, kind: input, shape index: {}]   ;;  %s3453_s22 = inlined_call_operand.vmem [shape: f32[32,16], index: 22, kind: input, shape index: {}]   ;;  %s3454_s23 = inlined_call_operand.vmem [shape: f32[16,32], index: 23, kind: input, shape index: {}]   ;;  %s3455_s24 = inlined_call_operand.vmem [shape: f32[2,16], index: 24, kind: input, shape index: {}]   ;;  %s3456_s25 = inlined_call_operand.hbm [shape: f32[2,32], index: 25, kind: output, shape index: {0}]   ;;  %s3457_s26 = inlined_call_operand.hbm [shape: f32[2,64], index: 26, kind: output, shape index: {1}]  }
   0x1   :  { %3465 = sst [smem:[#allocation8_spill]] %s3431_s0 }
   0x2   :  { %3466 = sst [smem:[#allocation9_spill]] %s3432_s1 }
   0x3   :  { %3467 = sst [smem:[#allocation10_spill]] %s3433_s2 }
   0x4   :  { %3468 = sst [smem:[#allocation11_spill]] %s3434_s3 }
   0x5   :  { %3469 = sst [smem:[#allocation12_spill]] %s3435_s4 }
   0x6   :  { %3470 = sst [smem:[#allocation13_spill]] %s3436_s5 }
   0x7   :  { %3471 = sst [smem:[#allocation14_spill]] %s3437_s6 }
   0x8   :  { %3472 = sst [smem:[#allocation15_spill]] %s3438_s7 }
   0x9   :  { %3473 = sst [smem:[#allocation16_spill]] %s3439_s8 }
   0xa   :  { %3474 = sst [smem:[#allocation17_spill]] %s3440_s9 }
   0xb   :  { %3475 = sst [smem:[#allocation18_spill]] %s3441_s10 }
   0xc   :  { %32 = vsyncpa [#allocation3], 0  ;;  %s3476_s7 = sld [smem:[#allocation10_spill]]  ;;  %vm92_vm0 = vcmask 130048  }
   0xd   :  { %s3477_s0 = sld [smem:[#allocation8_spill]] }
   0xe   :  { %s3478_s10 = sld [smem:[#allocation12_spill]] }
   0xf   :  { %s3479_s27 = sld [smem:[#allocation13_spill]] }
  0x10   :  { %s3480_s28 = sld [smem:[#allocation14_spill]] }
  0x12   :  { %v87_v0 = vld [vmem:[%s3476_s7 + $0x8] sm:$0xff]  ;;  %v86_v1 = vld [vmem:[%s3476_s7] sm:$0xff] }
  0x13   :  { %v84_v2 = vld [vmem:[%s3477_s0] sm:$0xff]  ;;  %113 = vmatpush.msra.mxu0 %v87_v0  ;;  %1917 = vmatpush.msra.mxu3 %v87_v0  ;;  %v85_v3 = vld [vmem:[%s3477_s0 + $0x8] sm:$0xff] }
  0x14   :  { %v129_v4 = vld [vmem:[%s3478_s10 + $0x18] sm:$0xff] }
  0x15   :  { %v167_v5 = vld [vmem:[%s3479_s27 + $0x18] sm:$0xff]  ;;  %153 = vmatpush.msra.mxu1 %v129_v4  ;;  %114 = vmatpush.msra.mxu0 %v86_v1 }
  0x16   :  { %184 = vmatpush.msra.mxu2 %v167_v5  ;;  %v198_v6 = vld [vmem:[%s3480_s28 + $0x18] sm:$0xff]  ;;  %1918 = vmatpush.msra.mxu3 %v86_v1 }
  0x17   :  { %1865 = vmatmul.msk.f32.vlgmr.msra.gmra.mxu0 %vm92_vm0, %v84_v2  ;;  %1866 = vmatmul.msk.f32.vlgmr.msra.gmra.mxu3 %vm92_vm0, %v85_v3 }
  0x18   :  { %215 = vmatpush.msrb.mxu3 %v198_v6 }
  0x19   :  { %33 = vsyncpa [#allocation5], 0  ;;  %v128_v7 = vld [vmem:[%s3478_s10 + $0x10] sm:$0xff]  ;;  %v127_v10 = vld [vmem:[%s3478_s10 + $0x8] sm:$0xff]  ;;  %s3481_s6 = sld [smem:[#allocation11_spill]]  ;;  %vm134_vm1 = vcmask 261120  }
  0x1a   :  { %v166_v8 = vld [vmem:[%s3479_s27 + $0x10] sm:$0xff]  ;;  %154 = vmatpush.msra.mxu1 %v128_v7  ;;  %v165_v11 = vld [vmem:[%s3479_s27 + $0x8] sm:$0xff]  ;;  %v126_v13 = vld [vmem:[%s3478_s10] sm:$0xff]  ;;  %s3482_s7 = sld [smem:[#allocation9_spill]] }
  0x1b   :  { %v197_v9 = vld [vmem:[%s3480_s28 + $0x10] sm:$0xff]  ;;  %185 = vmatpush.msra.mxu2 %v166_v8  ;;  %v196_v12 = vld [vmem:[%s3480_s28 + $0x8] sm:$0xff]  ;;  %v164_v14 = vld [vmem:[%s3479_s27] sm:$0xff]  ;;  %s3483_s1 = sld [smem:[#allocation15_spill]]  ;;  %s1851_s27 = sshll.u32 %s3457_s26, 4  ;;  %s1852_s27 = int_to_ptr.hbm [resolvable:$true] %s1851_s27 }
  0x1c   :  { %216 = vmatpush.msrb.mxu3 %v197_v9  ;;  %155 = vmatpush.msra.mxu1 %v127_v10  ;;  %v195_v15 = vld [vmem:[%s3480_s28] sm:$0xff]  ;;  %v229_v25 = vld [vmem:[%s3453_s22 + $0x18] sm:$0xff]  ;;  %v228_v26 = vld [vmem:[%s3453_s22 + $0x10] sm:$0xff]  ;;  %s3484_s10 = sld [smem:[#allocation16_spill]] }
  0x1d   :  { %186 = vmatpush.msra.mxu2 %v165_v11  ;;  %248 = vmatpush.msrb.mxu0 %v229_v25  ;;  %v227_v27 = vld [vmem:[%s3453_s22 + $0x8] sm:$0xff]  ;;  %v226_v28 = vld [vmem:[%s3453_s22] sm:$0xff]  ;;  %s3485_s29 = sld [smem:[#allocation18_spill]] }
  0x1e   :  { %217 = vmatpush.msrb.mxu3 %v196_v12  ;;  %156 = vmatpush.msra.mxu1 %v126_v13  ;;  %v231_v47 = vld [vmem:[%s3454_s23 + $0x8] sm:$0xff]  ;;  %v230_v49 = vld [vmem:[%s3454_s23] sm:$0xff] }
  0x1f   :  { %187 = vmatpush.msra.mxu2 %v164_v14  ;;  %v1922_v16 = vld [vmem:[%s3481_s6] ss:$0 sm:$0xff]  ;;  %249 = vmatpush.msrb.mxu0 %v228_v26 }
  0x20   :  { %218 = vmatpush.msrb.mxu3 %v195_v15  ;;  %v122_v18 = vld [vmem:[%s3482_s7] sm:$0xff]  ;;  %v123_v22 = vld [vmem:[%s3482_s7 + $0x8] sm:$0xff]  ;;  %273 = vmatpush.msrb.mxu1 %v229_v25  ;;  %s3486_s7 = sld [smem:[#allocation17_spill]] }
  0x21   :  { %250 = vmatpush.msrb.mxu0 %v227_v27  ;;  %v1923_v30 = vld [vmem:[%s3483_s1] ss:$0 sm:$0xff]  ;;  %323 = vmatpush.msrb.mxu2 %v231_v47 }
  0x22   :  { %274 = vmatpush.msrb.mxu1 %v228_v26  ;;  %v1924_v31 = vld [vmem:[%s3484_s10] ss:$0 sm:$0xff]  ;;  %348 = vmatpush.msra.mxu3 %v231_v47 }
  0x23   :  { %251 = vmatpush.msrb.mxu0 %v226_v28  ;;  %324 = vmatpush.msrb.mxu2 %v230_v49  ;;  %v483_v61 = vld [vmem:[%s3485_s29 + $0x18] sm:$0xff] }
  0x24   :  { %275 = vmatpush.msrb.mxu1 %v227_v27  ;;  %349 = vmatpush.msra.mxu3 %v230_v49 }
  0x25   :  { %372 = vmatpush.msra.mxu0 %v229_v25 }
  0x26   :  { %276 = vmatpush.msrb.mxu1 %v226_v28 }
  0x27   :  { %373 = vmatpush.msra.mxu0 %v228_v26 }
  0x29   :  { %374 = vmatpush.msra.mxu0 %v227_v27 }
  0x2b   :  { %375 = vmatpush.msra.mxu0 %v226_v28 }
  0x94   :  { %v116_v17 = vpop.f32.mrf.mxu0 }
  0x95   :  { %v117_v19 = vadd.f32 %v1922_v16, %v116_v17 }
  0x97   :  { %v2201_v20 = vadd.f32 %v122_v18, %v117_v19 }
  0x99   :  { %1867 = vmatmul.msk.f32.vlgmr.msra.gmra.mxu1 %vm134_vm1, %v2201_v20  ;;  %1869 = vmatmul.msk.f32.vlgmr.msra.gmra.mxu2 %vm134_vm1, %v2201_v20 }
  0x9a   :  { %1871 = vmatmul.msk.f32.vlgmr.msrb.gmra.mxu3 %vm134_vm1, %v2201_v20  ;;  %v119_v21 = vpop.f32.mrf.mxu3  ;;  %397 = vmatpush.msra.mxu1 %v229_v25 }
  0x9b   :  { %v120_v23 = vadd.f32 %v1922_v16, %v119_v21  ;;  %447 = vmatpush.msra.mxu2 %v231_v47  ;;  %472 = vmatpush.msrb.mxu3 %v231_v47 }
  0x9c   :  { %398 = vmatpush.msra.mxu1 %v228_v26 }
  0x9d   :  { %v2212_v24 = vadd.f32 %v123_v22, %v120_v23  ;;  %448 = vmatpush.msra.mxu2 %v230_v49  ;;  %473 = vmatpush.msrb.mxu3 %v230_v49 }
  0x9e   :  { %399 = vmatpush.msra.mxu1 %v227_v27 }
  0xa0   :  { %400 = vmatpush.msra.mxu1 %v226_v28 }
  0xa1   :  { %1868 = vmatmul.msk.f32.gmra.mxu1 %vm134_vm1, %v2212_v24  ;;  %1870 = vmatmul.msk.f32.gmra.mxu2 %vm134_vm1, %v2212_v24 }
  0xa2   :  { %1872 = vmatmul.msk.f32.gmra.mxu3 %vm134_vm1, %v2212_v24 }
 0x116   :  { %v158_v29 = vpop.f32.mrf.mxu1 }
 0x117   :  { %v159_v33 = vadd.f32 %v1923_v30, %v158_v29 }
 0x11c   :  { %v189_v32 = vpop.f32.mrf.mxu2 }
 0x11d   :  { %v190_v34 = vadd.f32 %v1924_v31, %v189_v32  ;;  %v482_v32 = vld [vmem:[%s3485_s29 + $0x10] sm:$0xff] }
 0x11e   :  { %v161_v36 = vpop.f32.mrf.mxu1 }
 0x11f   :  { %v232_v35 = vmul.f32 %v190_v34, %v159_v33  ;;  %v162_v37 = vadd.f32 %v1923_v30, %v161_v36 }
 0x121   :  { %1873 = vmatmul.msk.f32.vlgmr.msrb.gmra.mxu0 %vm134_vm1, %v232_v35  ;;  %v356_v40 = vmul.f32 %v190_v34, %v162_v37  ;;  %v480_v34 = vld [vmem:[%s3485_s29] sm:$0xff]  ;;  %v220_v35 = vpop.f32.mrf.mxu3 }
 0x122   :  { %506 = vmatpush.msrb.mxu0 %v483_v61 }
 0x124   :  { %v192_v38 = vpop.f32.mrf.mxu2  ;;  %507 = vmatpush.msrb.mxu0 %v482_v32  ;;  %v635_v32 = vld [vmem:[%s3445_s14 + $0x1a8] sm:$0xff] }
 0x125   :  { %v193_v39 = vadd.f32 %v1924_v31, %v192_v38 }
 0x127   :  { %v257_v41 = vmul.f32 %v193_v39, %v159_v33  ;;  %v381_v42 = vmul.f32 %v193_v39, %v162_v37  ;;  %v481_v33 = vld [vmem:[%s3485_s29 + $0x8] sm:$0xff]  ;;  %v1925_v37 = vld [vmem:[%s3486_s7] ss:$0 sm:$0xff]  ;;  %s1840_s7 = sshll.u32 %s3456_s25, 4  ;;  %s1841_s7 = int_to_ptr.hbm [resolvable:$true] %s1840_s7 }
 0x128   :  { %508 = vmatpush.msrb.mxu0 %v481_v33  ;;  %v221_v38 = vadd.f32 %v1925_v37, %v220_v35  ;;  %v636_v33 = vld [vmem:[%s3445_s14 + $0x1b0] sm:$0xff]  ;;  %v618_v35 = vld [vmem:[%s3445_s14 + $0x120] sm:$0xff] }
 0x129   :  { %1874 = vmatmul.msk.f32.vlgmr.msrb.gmra.mxu1 %vm134_vm1, %v257_v41  ;;  %1877 = vmatmul.msk.f32.vlgmr.msra.gmra.mxu0 %vm134_vm1, %v356_v40  ;;  %v223_v36 = vpop.f32.mrf.mxu3 }
 0x12a   :  { %509 = vmatpush.msrb.mxu0 %v480_v34  ;;  %v224_v39 = vadd.f32 %v1925_v37, %v223_v36  ;;  %v637_v34 = vld [vmem:[%s3445_s14 + $0x1b8] sm:$0xff]  ;;  %v619_v36 = vld [vmem:[%s3445_s14 + $0x128] sm:$0xff] }
 0x131   :  { %1878 = vmatmul.msk.f32.vlgmr.msra.gmra.mxu1 %vm134_vm1, %v381_v42 }
 0x19e   :  { %v253_v43 = vpop.f32.mrf.mxu0 }
 0x19f   :  { %v256_v45 = vmul.f32 0.70710677, %v253_v43 }
 0x1a6   :  { %v278_v44 = vpop.f32.mrf.mxu1  ;;  %v377_v52 = vpop.f32.mrf.mxu0 }
 0x1a7   :  { %v281_v46 = vmul.f32 0.70710677, %v278_v44  ;;  %v380_v56 = vmul.f32 0.70710677, %v377_v52 }
 0x1a9   :  { %v282_v48 = vmax.f32 %v256_v45, %v281_v46 }
 0x1ab   :  { %v283_v50 = vsub.f32 %v256_v45, %v282_v48  ;;  %v286_v51 = vsub.f32 %v281_v46, %v282_v48 }
 0x1ad   :  { %v284_v53 = vmul.f32 1.442695, %v283_v50  ;;  %v287_v54 = vmul.f32 1.442695, %v286_v51  ;;  %v1926_v50 = vld [vmem:[%s3442_s11] ss:$0 sm:$0xff] }
 0x1ae   :  { %v402_v55 = vpop.f32.mrf.mxu1 }
 0x1af   :  { %1933 = vpow2.f32 %v284_v53  ;;  %v405_v57 = vmul.f32 0.70710677, %v402_v55 }
 0x1b0   :  { %1935 = vpow2.f32 %v287_v54 }
 0x1b1   :  { %v406_v58 = vmax.f32 %v380_v56, %v405_v57 }
 0x1b3   :  { %v407_v59 = vsub.f32 %v380_v56, %v406_v58  ;;  %v410_v60 = vsub.f32 %v405_v57, %v406_v58 }
 0x1b5   :  { %v1934_v62 = vpop.eup %1933  ;;  %v408_v63 = vmul.f32 1.442695, %v407_v59  ;;  %v411_v0 = vmul.f32 1.442695, %v410_v60  ;;  %v2007_v59 = vmov 32.0  }
 0x1b6   :  { %v1936_v1 = vpop.eup %1935 }
 0x1b7   :  { %v289_v2 = vadd.f32 %v1936_v1, %v1934_v62  ;;  %1937 = vpow2.f32 %v408_v63 }
 0x1b8   :  { %1939 = vpow2.f32 %v411_v0 }
 0x1b9   :  { %1941 = vrcp.f32 %v289_v2  ;;  %v301_v9 = vand.u32 2147483648, %v289_v2  ;;  %v299_v11 = vand.u32 2147483647, %v289_v2  ;;  %vm295_vm3 = vweird.f32 %v289_v2 }
 0x1bb   :  { %v302_v14 = vor.u32 1.1754944e-38, %v301_v9  ;;  %vm300_vm5 = vcmp.eq.f32.partialorder %v299_v11, 8.507059e+37  ;;  %v631_v11 = vld [vmem:[%s3445_s14 + $0x188] sm:$0xff] }
 0x1bd   :  { %v1938_v3 = vpop.eup %1937 }
 0x1be   :  { %v1940_v4 = vpop.eup %1939 }
 0x1bf   :  { %v1942_v5 = vpop.eup %1941  ;;  %v413_v6 = vadd.f32 %v1940_v4, %v1938_v3 }
 0x1c0   :  { %v291_v7 = vmul.f32 %v1942_v5, %v289_v2  ;;  %vm296_vm2 = vweird.f32 %v1942_v5 }
 0x1c1   :  { %1943 = vrcp.f32 %v413_v6  ;;  %vm297_vm4 = vmor %vm295_vm3, %vm296_vm2  ;;  %v425_v22 = vand.u32 2147483648, %v413_v6  ;;  %v423_v25 = vand.u32 2147483647, %v413_v6  ;;  %vm419_vm7 = vweird.f32 %v413_v6 }
 0x1c2   :  { %v292_v8 = vsub.f32 1.0, %v291_v7  ;;  %1945 = vrcp.f32 %v2007_v59 }
 0x1c3   :  { %v426_v27 = vor.u32 1.1754944e-38, %v425_v22  ;;  %vm424_vm9 = vcmp.eq.f32.partialorder %v423_v25, 8.507059e+37  ;;  %v601_v22 = vld [vmem:[%s3445_s14 + $0x98] sm:$0xff]  ;;  %v583_v25 = vld [vmem:[%s3445_s14 + $0x8] sm:$0xff] }
 0x1c4   :  { %v293_v10 = vmul.f32 %v1942_v5, %v292_v8 }
 0x1c6   :  { %v294_v12 = vadd.f32 %v1942_v5, %v293_v10  ;;  %v630_v10 = vld [vmem:[%s3445_s14 + $0x180] sm:$0xff] }
 0x1c7   :  { %v1944_v13 = vpop.eup %1943  ;;  %700 = vmatpush.msrb.mxu1 %v630_v10  ;;  %v623_v10 = vld [vmem:[%s3445_s14 + $0x148] sm:$0xff] }
 0x1c8   :  { %v415_v15 = vmul.f32 %v1944_v13, %v413_v6  ;;  %v298_v16 = vsel %vm297_vm4, %v1942_v5, %v294_v12  ;;  %vm420_vm6 = vweird.f32 %v1944_v13  ;;  %v1946_v60 = vpop.eup %1945  ;;  %v632_v12 = vld [vmem:[%s3445_s14 + $0x190] sm:$0xff] }
 0x1c9   :  { %v303_v17 = vsel %vm300_vm5, %v302_v14, %v298_v16  ;;  %vm421_vm8 = vmor %vm419_vm7, %vm420_vm6  ;;  %v526_v61 = vmul.f32 32.0, %v1946_v60  ;;  %vm530_vm10 = vweird.f32 %v1946_v60  ;;  %v614_v14 = vld [vmem:[%s3445_s14 + $0x100] sm:$0xff]  ;;  %v616_v16 = vld [vmem:[%s3445_s14 + $0x110] sm:$0xff] }
 0x1ca   :  { %v416_v18 = vsub.f32 1.0, %v415_v15  ;;  %v305_v19 = vmul.f32 %v1934_v62, %v303_v17  ;;  %v330_v21 = vmul.f32 %v1936_v1, %v303_v17  ;;  %v615_v15 = vld [vmem:[%s3445_s14 + $0x108] sm:$0xff]  ;;  %701 = vmatpush.msrb.mxu1 %v614_v14  ;;  %v617_v17 = vld [vmem:[%s3445_s14 + $0x118] sm:$0xff]  ;;  %v606_v14 = vld [vmem:[%s3445_s14 + $0xc0] sm:$0xff] }
 0x1cb   :  { %v527_v62 = vsub.f32 1.0, %v526_v61  ;;  %v1928_v61 = vld [vmem:[%s3444_s13] ss:$0 sm:$0xff] }
 0x1cc   :  { %v417_v23 = vmul.f32 %v1944_v13, %v416_v18  ;;  %1875 = vmatmul.msk.f32.vlgmr.msrb.gmra.mxu2 %vm92_vm0, %v305_v19  ;;  %1876 = vmatmul.msk.f32.vlgmr.msra.gmra.mxu3 %vm92_vm0, %v330_v21  ;;  %v598_v18 = vld [vmem:[%s3445_s14 + $0x80] sm:$0xff]  ;;  %v599_v19 = vld [vmem:[%s3445_s14 + $0x88] sm:$0xff]  ;;  %v600_v21 = vld [vmem:[%s3445_s14 + $0x90] sm:$0xff] }
 0x1cd   :  { %v528_v63 = vmul.f32 %v1946_v60, %v527_v62  ;;  %723 = vmatpush.msrb.mxu2 %v631_v11  ;;  %746 = vmatpush.msra.mxu3 %v632_v12  ;;  %v624_v12 = vld [vmem:[%s3445_s14 + $0x150] sm:$0xff] }
 0x1ce   :  { %v418_v26 = vadd.f32 %v1944_v13, %v417_v23  ;;  %702 = vmatpush.msrb.mxu1 %v598_v18  ;;  %v582_v23 = vld [vmem:[%s3445_s14] sm:$0xff] }
 0x1cf   :  { %v529_v0 = vadd.f32 %v1946_v60, %v528_v63  ;;  %724 = vmatpush.msrb.mxu2 %v615_v15  ;;  %747 = vmatpush.msra.mxu3 %v616_v16  ;;  %v608_v16 = vld [vmem:[%s3445_s14 + $0xd0] sm:$0xff] }
 0x1d0   :  { %v422_v28 = vsel %vm421_vm8, %v1944_v13, %v418_v26  ;;  %v633_v13 = vld [vmem:[%s3445_s14 + $0x198] sm:$0xff]  ;;  %v584_v26 = vld [vmem:[%s3445_s14 + $0x10] sm:$0xff]  ;;  %703 = vmatpush.msrb.mxu1 %v582_v23 }
 0x1d1   :  { %v427_v29 = vsel %vm424_vm9, %v426_v27, %v422_v28  ;;  %v2276_v1 = vsel %vm530_vm10, %v1946_v60, %v529_v0  ;;  %769 = vmatpush.msra.mxu0 %v633_v13  ;;  %725 = vmatpush.msrb.mxu2 %v599_v19  ;;  %v585_v27 = vld [vmem:[%s3445_s14 + $0x18] sm:$0xff]  ;;  %v590_v19 = vld [vmem:[%s3445_s14 + $0x40] sm:$0xff]  ;;  %vm1829_vm9 = vcmask 254976  }
 0x1d2   :  { %v454_v30 = vmul.f32 %v1940_v4, %v427_v29  ;;  %v429_v31 = vmul.f32 %v1938_v3, %v427_v29  ;;  %748 = vmatpush.msra.mxu3 %v600_v21  ;;  %v625_v13 = vld [vmem:[%s3445_s14 + $0x158] sm:$0xff]  ;;  %v591_v21 = vld [vmem:[%s3445_s14 + $0x48] sm:$0xff] }
 0x1d3   :  { %770 = vmatpush.msra.mxu0 %v617_v17  ;;  %726 = vmatpush.msrb.mxu2 %v583_v25  ;;  %v609_v17 = vld [vmem:[%s3445_s14 + $0xd8] sm:$0xff]  ;;  %v642_v25 = vld [vmem:[%s3445_s14 + $0x1e0] sm:$0xff] }
 0x1d4   :  { %1879 = vmatmul.msk.f32.vlgmr.msra.gmra.mxu2 %vm92_vm0, %v429_v31  ;;  %1880 = vmatmul.msk.f32.vlgmr.msrb.gmra.mxu3 %vm92_vm0, %v454_v30  ;;  %v634_v31 = vld [vmem:[%s3445_s14 + $0x1a0] sm:$0xff]  ;;  %v593_v23 = vld [vmem:[%s3445_s14 + $0x58] sm:$0xff] }
 0x1d5   :  { %771 = vmatpush.msra.mxu0 %v601_v22  ;;  %749 = vmatpush.msra.mxu3 %v584_v26  ;;  %v592_v22 = vld [vmem:[%s3445_s14 + $0x50] sm:$0xff]  ;;  %v643_v26 = vld [vmem:[%s3445_s14 + $0x1e8] sm:$0xff] }
 0x1d6   :  { %792 = vmatpush.msra.mxu1 %v634_v31  ;;  %815 = vmatpush.msra.mxu2 %v635_v32  ;;  %v628_v31 = vld [vmem:[%s3445_s14 + $0x170] sm:$0xff]  ;;  %v629_v32 = vld [vmem:[%s3445_s14 + $0x178] sm:$0xff] }
 0x1d7   :  { %772 = vmatpush.msra.mxu0 %v585_v27  ;;  %838 = vmatpush.msrb.mxu3 %v636_v33  ;;  %v644_v27 = vld [vmem:[%s3445_s14 + $0x1f0] sm:$0xff]  ;;  %v610_v33 = vld [vmem:[%s3445_s14 + $0xe0] sm:$0xff] }
 0x1d8   :  { %793 = vmatpush.msra.mxu1 %v618_v35  ;;  %816 = vmatpush.msra.mxu2 %v619_v36  ;;  %v612_v35 = vld [vmem:[%s3445_s14 + $0xf0] sm:$0xff]  ;;  %v613_v36 = vld [vmem:[%s3445_s14 + $0xf8] sm:$0xff] }
 0x24f   :  { %v326_v40 = vpop.f32.mrf.mxu2  ;;  %v351_v41 = vpop.f32.mrf.mxu3 }
 0x250   :  { %v329_v42 = vmul.f32 %v326_v40, %v221_v38  ;;  %v354_v43 = vmul.f32 %v351_v41, %v224_v39  ;;  %v602_v40 = vld [vmem:[%s3445_s14 + $0xa0] sm:$0xff] }
 0x251   :  { %794 = vmatpush.msra.mxu1 %v602_v40  ;;  %v597_v40 = vld [vmem:[%s3445_s14 + $0x78] sm:$0xff] }
 0x252   :  { %v355_v44 = vadd.f32 %v354_v43, %v329_v42  ;;  %v603_v42 = vld [vmem:[%s3445_s14 + $0xa8] sm:$0xff]  ;;  %v604_v43 = vld [vmem:[%s3445_s14 + $0xb0] sm:$0xff] }
 0x253   :  { %817 = vmatpush.msra.mxu2 %v603_v42  ;;  %v1151_v42 = vld [vmem:[%s3447_s16 + $0x1f8] sm:$0xff] }
 0x254   :  { %1881 = vmatmul.msk.f32.vlgmr.msrb.gmra.mxu0 %vm134_vm1, %v355_v44  ;;  %v605_v44 = vld [vmem:[%s3445_s14 + $0xb8] sm:$0xff] }
 0x255   :  { %861 = vmatpush.msrb.mxu0 %v637_v34  ;;  %v611_v34 = vld [vmem:[%s3445_s14 + $0xe8] sm:$0xff] }
 0x257   :  { %v450_v45 = vpop.f32.mrf.mxu2  ;;  %v475_v46 = vpop.f32.mrf.mxu3 }
 0x258   :  { %v453_v47 = vmul.f32 %v450_v45, %v221_v38  ;;  %v478_v48 = vmul.f32 %v475_v46, %v224_v39  ;;  %v620_v38 = vld [vmem:[%s3445_s14 + $0x130] sm:$0xff]  ;;  %v621_v39 = vld [vmem:[%s3445_s14 + $0x138] sm:$0xff]  ;;  %v586_v45 = vld [vmem:[%s3445_s14 + $0x20] sm:$0xff] }
 0x259   :  { %839 = vmatpush.msrb.mxu3 %v620_v38  ;;  %862 = vmatpush.msrb.mxu0 %v621_v39  ;;  %v587_v46 = vld [vmem:[%s3445_s14 + $0x28] sm:$0xff]  ;;  %v596_v39 = vld [vmem:[%s3445_s14 + $0x70] sm:$0xff] }
 0x25a   :  { %v479_v49 = vadd.f32 %v478_v48, %v453_v47  ;;  %795 = vmatpush.msra.mxu1 %v586_v45  ;;  %818 = vmatpush.msra.mxu2 %v587_v46  ;;  %v595_v38 = vld [vmem:[%s3445_s14 + $0x68] sm:$0xff]  ;;  %v1102_v45 = vld [vmem:[%s3447_s16 + $0x70] sm:$0xff] }
 0x25b   :  { %840 = vmatpush.msrb.mxu3 %v604_v43  ;;  %863 = vmatpush.msrb.mxu0 %v605_v44  ;;  %v1119_v43 = vld [vmem:[%s3447_s16 + $0xf8] sm:$0xff]  ;;  %v1150_v46 = vld [vmem:[%s3447_s16 + $0x1f0] sm:$0xff] }
 0x25c   :  { %1882 = vmatmul.msk.f32.gmra.mxu0 %vm134_vm1, %v479_v49  ;;  %v588_v49 = vld [vmem:[%s3445_s14 + $0x30] sm:$0xff]  ;;  %v1135_v44 = vld [vmem:[%s3447_s16 + $0x178] sm:$0xff] }
 0x25d   :  { %841 = vmatpush.msrb.mxu3 %v588_v49  ;;  %v1101_v49 = vld [vmem:[%s3447_s16 + $0x68] sm:$0xff] }
 0x2d1   :  { %v511_v51 = vpop.f32.mrf.mxu0 }
 0x2d2   :  { %v512_v52 = vadd.f32 %v1926_v50, %v511_v51 }
 0x2d4   :  { %v517_v53 = vadd.f32 %v512_v52, %v2201_v20 }
 0x2d6   :  { %v519_v54 = vsel %vm134_vm1, %v517_v53, 0.0 }
 0x2d7   :  { %520 = vadd.xlane.f32.xlu0 %v519_v54 }
 0x2d9   :  { %v514_v55 = vpop.f32.mrf.mxu0 }
 0x2da   :  { %v515_v56 = vadd.f32 %v1926_v50, %v514_v55  ;;  %v589_v50 = vld [vmem:[%s3445_s14 + $0x38] sm:$0xff] }
 0x2db   :  { %864 = vmatpush.msrb.mxu0 %v589_v50  ;;  %v1149_v50 = vld [vmem:[%s3447_s16 + $0x1e8] sm:$0xff] }
 0x2dc   :  { %v518_v57 = vadd.f32 %v515_v56, %v2212_v24 }
 0x2de   :  { %v522_v58 = vsel %vm134_vm1, %v518_v57, 0.0 }
 0x2df   :  { %523 = vadd.xlane.f32.xlu0 %v522_v58  ;;  %v1927_v58 = vld [vmem:[%s3443_s12] ss:$0 sm:$0xff] }
 0x34a   :  { %v521_v20 = vpop.xlane.xlu0 %520 }
 0x34b   :  { %v532_v2 = vmul.f32 %v2276_v1, %v521_v20 }
 0x34d   :  { %v2279_v3 = vsub.f32 %v517_v53, %v532_v2 }
 0x34f   :  { %v536_v24 = vmul.f32 %v2279_v3, %v2279_v3 }
 0x351   :  { %v538_v4 = vsel %vm134_vm1, %v536_v24, 0.0 }
 0x352   :  { %539 = vadd.xlane.f32.xlu1 %v538_v4  ;;  %v524_v5 = vpop.xlane.xlu0 %523  ;;  %v638_v4 = vld [vmem:[%s3445_s14 + $0x1c0] sm:$0xff] }
 0x353   :  { %v533_v6 = vmul.f32 %v2276_v1, %v524_v5  ;;  %v639_v5 = vld [vmem:[%s3445_s14 + $0x1c8] sm:$0xff] }
 0x355   :  { %v2285_v7 = vsub.f32 %v518_v57, %v533_v6  ;;  %v641_v6 = vld [vmem:[%s3445_s14 + $0x1d8] sm:$0xff] }
 0x357   :  { %v537_v8 = vmul.f32 %v2285_v7, %v2285_v7 }
 0x359   :  { %v541_v9 = vsel %vm134_vm1, %v537_v8, 0.0 }
 0x35a   :  { %542 = vadd.xlane.f32.xlu1 %v541_v9  ;;  %v622_v9 = vld [vmem:[%s3445_s14 + $0x140] sm:$0xff] }
 0x3c5   :  { %v540_v28 = vpop.xlane.xlu1 %539 }
 0x3c6   :  { %v544_v29 = vmul.f32 %v540_v28, %v2276_v1  ;;  %v645_v28 = vld [vmem:[%s3445_s14 + $0x1f8] sm:$0xff] }
 0x3c8   :  { %v546_v30 = vadd.f32 1e-05, %v544_v29  ;;  %v626_v29 = vld [vmem:[%s3445_s14 + $0x160] sm:$0xff] }
 0x3ca   :  { %1947 = vrsqrt.f32 %v546_v30  ;;  %vm554_vm12 = vweird.f32 %v546_v30 }
 0x3cd   :  { %v543_v37 = vpop.xlane.xlu1 %542 }
 0x3ce   :  { %v545_v41 = vmul.f32 %v543_v37, %v2276_v1  ;;  %v594_v37 = vld [vmem:[%s3445_s14 + $0x60] sm:$0xff] }
 0x3d0   :  { %v1948_v47 = vpop.eup %1947  ;;  %v547_v48 = vadd.f32 1e-05, %v545_v41  ;;  %v1103_v41 = vld [vmem:[%s3447_s16 + $0x78] sm:$0xff] }
 0x3d1   :  { %v549_v51 = vmul.f32 %v1948_v47, %v546_v30  ;;  %vm555_vm11 = vweird.f32 %v1948_v47  ;;  %v627_v30 = vld [vmem:[%s3445_s14 + $0x168] sm:$0xff] }
 0x3d2   :  { %1949 = vrsqrt.f32 %v547_v48  ;;  %vm556_vm13 = vmor %vm554_vm12, %vm555_vm11  ;;  %vm564_vm15 = vweird.f32 %v547_v48 }
 0x3d3   :  { %v550_v52 = vmul.f32 %v1948_v47, %v549_v51  ;;  %v1117_v51 = vld [vmem:[%s3447_s16 + $0xe8] sm:$0xff] }
 0x3d5   :  { %v551_v53 = vmul.f32 0.5, %v550_v52  ;;  %v1133_v52 = vld [vmem:[%s3447_s16 + $0x168] sm:$0xff] }
 0x3d7   :  { %v552_v54 = vsub.f32 1.5, %v551_v53  ;;  %v1100_v53 = vld [vmem:[%s3447_s16 + $0x60] sm:$0xff] }
 0x3d8   :  { %v1950_v55 = vpop.eup %1949 }
 0x3d9   :  { %v553_v56 = vmul.f32 %v1948_v47, %v552_v54  ;;  %v559_v57 = vmul.f32 %v1950_v55, %v547_v48  ;;  %vm565_vm14 = vweird.f32 %v1950_v55  ;;  %v1134_v48 = vld [vmem:[%s3447_s16 + $0x170] sm:$0xff]  ;;  %v1148_v54 = vld [vmem:[%s3447_s16 + $0x1e0] sm:$0xff] }
 0x3da   :  { %vm566_vm2 = vmor %vm564_vm15, %vm565_vm14 }
 0x3db   :  { %v557_v59 = vsel %vm556_vm13, %v1948_v47, %v553_v56  ;;  %v560_v60 = vmul.f32 %v1950_v55, %v559_v57  ;;  %v1118_v47 = vld [vmem:[%s3447_s16 + $0xf0] sm:$0xff]  ;;  %v1132_v56 = vld [vmem:[%s3447_s16 + $0x160] sm:$0xff]  ;;  %v1099_v57 = vld [vmem:[%s3447_s16 + $0x58] sm:$0xff] }
 0x3dc   :  { %v568_v62 = vmul.f32 %v557_v59, %v2279_v3  ;;  %v640_v3 = vld [vmem:[%s3445_s14 + $0x1d0] sm:$0xff]  ;;  %v1115_v59 = vld [vmem:[%s3447_s16 + $0xd8] sm:$0xff] }
 0x3dd   :  { %v561_v63 = vmul.f32 0.5, %v560_v60  ;;  %v1131_v60 = vld [vmem:[%s3447_s16 + $0x158] sm:$0xff] }
 0x3de   :  { %v574_v0 = vmul.f32 %v1927_v58, %v568_v62  ;;  %v1146_v62 = vld [vmem:[%s3447_s16 + $0x1d0] sm:$0xff] }
 0x3df   :  { %v562_v20 = vsub.f32 1.5, %v561_v63  ;;  %v1114_v63 = vld [vmem:[%s3447_s16 + $0xd0] sm:$0xff] }
 0x3e0   :  { %v2395_v2 = vadd.f32 %v1928_v61, %v574_v0  ;;  %v1130_v0 = vld [vmem:[%s3447_s16 + $0x150] sm:$0xff] }
 0x3e1   :  { %v563_v24 = vmul.f32 %v1950_v55, %v562_v20  ;;  %v1097_v20 = vld [vmem:[%s3447_s16 + $0x48] sm:$0xff] }
 0x3e2   :  { %1883 = vmatmul.msk.f32.vlgmr.msrb.gmra.mxu1 %vm134_vm1, %v2395_v2  ;;  %1885 = vmatmul.msk.f32.vlgmr.msrb.gmra.mxu2 %vm134_vm1, %v2395_v2 }
 0x3e3   :  { %v567_v8 = vsel %vm566_vm2, %v1950_v55, %v563_v24  ;;  %1887 = vmatmul.msk.f32.vlgmr.msra.gmra.mxu3 %vm134_vm1, %v2395_v2  ;;  %1889 = vmatmul.msk.f32.vlgmr.msra.gmra.mxu0 %vm134_vm1, %v2395_v2  ;;  %v1116_v55 = vld [vmem:[%s3447_s16 + $0xe0] sm:$0xff]  ;;  %v1145_v24 = vld [vmem:[%s3447_s16 + $0x1c8] sm:$0xff] }
 0x3e4   :  { %v569_v11 = vmul.f32 %v567_v8, %v2285_v7  ;;  %884 = vmatpush.msrb.mxu1 %v638_v4  ;;  %907 = vmatpush.msrb.mxu2 %v639_v5  ;;  %v607_v7 = vld [vmem:[%s3445_s14 + $0xc8] sm:$0xff]  ;;  %v1112_v8 = vld [vmem:[%s3447_s16 + $0xc0] sm:$0xff] }
 0x3e5   :  { %930 = vmatpush.msra.mxu3 %v640_v3  ;;  %953 = vmatpush.msra.mxu0 %v641_v6  ;;  %v1113_v4 = vld [vmem:[%s3447_s16 + $0xc8] sm:$0xff]  ;;  %v1096_v3 = vld [vmem:[%s3447_s16 + $0x40] sm:$0xff] }
 0x3e6   :  { %v575_v15 = vmul.f32 %v1927_v58, %v569_v11  ;;  %885 = vmatpush.msrb.mxu1 %v622_v9  ;;  %908 = vmatpush.msrb.mxu2 %v623_v10  ;;  %v1147_v58 = vld [vmem:[%s3447_s16 + $0x1d8] sm:$0xff]  ;;  %v1129_v5 = vld [vmem:[%s3447_s16 + $0x148] sm:$0xff]  ;;  %v1144_v6 = vld [vmem:[%s3447_s16 + $0x1c0] sm:$0xff] }
 0x3e7   :  { %931 = vmatpush.msra.mxu3 %v624_v12  ;;  %954 = vmatpush.msra.mxu0 %v625_v13  ;;  %v1128_v9 = vld [vmem:[%s3447_s16 + $0x140] sm:$0xff]  ;;  %v1095_v10 = vld [vmem:[%s3447_s16 + $0x38] sm:$0xff] }
 0x3e8   :  { %v2442_v18 = vadd.f32 %v1928_v61, %v575_v15  ;;  %886 = vmatpush.msrb.mxu1 %v606_v14  ;;  %909 = vmatpush.msrb.mxu2 %v607_v7  ;;  %v1098_v61 = vld [vmem:[%s3447_s16 + $0x50] sm:$0xff]  ;;  %v1143_v11 = vld [vmem:[%s3447_s16 + $0x1b8] sm:$0xff] }
 0x3e9   :  { %932 = vmatpush.msra.mxu3 %v608_v16  ;;  %955 = vmatpush.msra.mxu0 %v609_v17  ;;  %v1111_v12 = vld [vmem:[%s3447_s16 + $0xb8] sm:$0xff]  ;;  %v1094_v14 = vld [vmem:[%s3447_s16 + $0x30] sm:$0xff]  ;;  %v1093_v17 = vld [vmem:[%s3447_s16 + $0x28] sm:$0xff] }
 0x3ea   :  { %1884 = vmatmul.msk.f32.gmra.mxu1 %vm134_vm1, %v2442_v18  ;;  %1886 = vmatmul.msk.f32.gmra.mxu2 %vm134_vm1, %v2442_v18  ;;  %v1127_v13 = vld [vmem:[%s3447_s16 + $0x138] sm:$0xff]  ;;  %v1142_v7 = vld [vmem:[%s3447_s16 + $0x1b0] sm:$0xff] }
 0x3eb   :  { %1888 = vmatmul.msk.f32.gmra.mxu3 %vm134_vm1, %v2442_v18  ;;  %1890 = vmatmul.msk.f32.gmra.mxu0 %vm134_vm1, %v2442_v18  ;;  %v1110_v15 = vld [vmem:[%s3447_s16 + $0xb0] sm:$0xff] }
 0x3ec   :  { %887 = vmatpush.msrb.mxu1 %v590_v19  ;;  %910 = vmatpush.msrb.mxu2 %v591_v21  ;;  %v1126_v16 = vld [vmem:[%s3447_s16 + $0x130] sm:$0xff]  ;;  %v1141_v19 = vld [vmem:[%s3447_s16 + $0x1a8] sm:$0xff] }
 0x3ed   :  { %933 = vmatpush.msra.mxu3 %v592_v22  ;;  %956 = vmatpush.msra.mxu0 %v593_v23  ;;  %v1109_v21 = vld [vmem:[%s3447_s16 + $0xa8] sm:$0xff]  ;;  %v1092_v23 = vld [vmem:[%s3447_s16 + $0x20] sm:$0xff] }
 0x3ee   :  { %v1125_v22 = vld [vmem:[%s3447_s16 + $0x128] sm:$0xff] }
 0x3f2   :  { %1891 = vmatmul.msk.f32.vlgmr.msra.gmra.mxu1 %vm134_vm1, %v2395_v2  ;;  %1893 = vmatmul.msk.f32.vlgmr.msra.gmra.mxu2 %vm134_vm1, %v2395_v2 }
 0x3f3   :  { %1895 = vmatmul.msk.f32.vlgmr.msrb.gmra.mxu3 %vm134_vm1, %v2395_v2  ;;  %1897 = vmatmul.msk.f32.vlgmr.msrb.gmra.mxu0 %vm134_vm1, %v2395_v2 }
 0x3f4   :  { %976 = vmatpush.msra.mxu1 %v642_v25  ;;  %999 = vmatpush.msra.mxu2 %v643_v26  ;;  %v1140_v25 = vld [vmem:[%s3447_s16 + $0x1a0] sm:$0xff] }
 0x3f5   :  { %1022 = vmatpush.msrb.mxu3 %v644_v27  ;;  %1045 = vmatpush.msrb.mxu0 %v645_v28  ;;  %v1108_v26 = vld [vmem:[%s3447_s16 + $0xa0] sm:$0xff]  ;;  %v1091_v28 = vld [vmem:[%s3447_s16 + $0x18] sm:$0xff] }
 0x3f6   :  { %977 = vmatpush.msra.mxu1 %v626_v29  ;;  %1000 = vmatpush.msra.mxu2 %v627_v30  ;;  %v1124_v27 = vld [vmem:[%s3447_s16 + $0x120] sm:$0xff]  ;;  %v1139_v29 = vld [vmem:[%s3447_s16 + $0x198] sm:$0xff] }
 0x3f7   :  { %1023 = vmatpush.msrb.mxu3 %v628_v31  ;;  %1046 = vmatpush.msrb.mxu0 %v629_v32  ;;  %v1107_v30 = vld [vmem:[%s3447_s16 + $0x98] sm:$0xff]  ;;  %v1090_v32 = vld [vmem:[%s3447_s16 + $0x10] sm:$0xff] }
 0x3f8   :  { %978 = vmatpush.msra.mxu1 %v610_v33  ;;  %1001 = vmatpush.msra.mxu2 %v611_v34  ;;  %v1123_v31 = vld [vmem:[%s3447_s16 + $0x118] sm:$0xff]  ;;  %v1138_v33 = vld [vmem:[%s3447_s16 + $0x190] sm:$0xff] }
 0x3f9   :  { %1024 = vmatpush.msrb.mxu3 %v612_v35  ;;  %1047 = vmatpush.msrb.mxu0 %v613_v36  ;;  %v1106_v34 = vld [vmem:[%s3447_s16 + $0x90] sm:$0xff]  ;;  %v1089_v36 = vld [vmem:[%s3447_s16 + $0x8] sm:$0xff] }
 0x3fa   :  { %1892 = vmatmul.msk.f32.gmra.mxu1 %vm134_vm1, %v2442_v18  ;;  %1894 = vmatmul.msk.f32.gmra.mxu2 %vm134_vm1, %v2442_v18  ;;  %v1122_v35 = vld [vmem:[%s3447_s16 + $0x110] sm:$0xff] }
 0x3fb   :  { %1896 = vmatmul.msk.f32.gmra.mxu3 %vm134_vm1, %v2442_v18  ;;  %1898 = vmatmul.msk.f32.gmra.mxu0 %vm134_vm1, %v2442_v18 }
 0x3fc   :  { %979 = vmatpush.msra.mxu1 %v594_v37  ;;  %1002 = vmatpush.msra.mxu2 %v595_v38  ;;  %v1137_v37 = vld [vmem:[%s3447_s16 + $0x188] sm:$0xff] }
 0x3fd   :  { %1025 = vmatpush.msrb.mxu3 %v596_v39  ;;  %1048 = vmatpush.msrb.mxu0 %v597_v40  ;;  %v1105_v38 = vld [vmem:[%s3447_s16 + $0x88] sm:$0xff]  ;;  %v1088_v40 = vld [vmem:[%s3447_s16] sm:$0xff] }
 0x3fe   :  { %v1121_v39 = vld [vmem:[%s3447_s16 + $0x108] sm:$0xff] }
 0x402   :  { %1899 = vmatmul.msk.f32.vlgmr.msrb.gmra.mxu1 %vm134_vm1, %v2395_v2  ;;  %1901 = vmatmul.msk.f32.vlgmr.msrb.gmra.mxu2 %vm134_vm1, %v2395_v2 }
 0x403   :  { %1903 = vmatmul.msk.f32.vlgmr.msra.gmra.mxu3 %vm134_vm1, %v2395_v2  ;;  %1905 = vmatmul.msk.f32.vlgmr.msra.gmra.mxu0 %vm134_vm1, %v2395_v2 }
 0x404   :  { %1348 = vmatpush.msrb.mxu1 %v1103_v41  ;;  %1417 = vmatpush.msra.mxu0 %v1151_v42  ;;  %v1136_v41 = vld [vmem:[%s3447_s16 + $0x180] sm:$0xff]  ;;  %v1167_v42 = vld [vmem:[%s3447_s16 + $0x278] sm:$0xff] }
 0x405   :  { %1371 = vmatpush.msrb.mxu2 %v1119_v43  ;;  %1394 = vmatpush.msra.mxu3 %v1135_v44  ;;  %v1215_v43 = vld [vmem:[%s3447_s16 + $0x3f8] sm:$0xff]  ;;  %v1104_v44 = vld [vmem:[%s3447_s16 + $0x80] sm:$0xff] }
 0x406   :  { %1349 = vmatpush.msrb.mxu1 %v1102_v45  ;;  %1418 = vmatpush.msra.mxu0 %v1150_v46  ;;  %v1120_v45 = vld [vmem:[%s3447_s16 + $0x100] sm:$0xff]  ;;  %v1166_v46 = vld [vmem:[%s3447_s16 + $0x270] sm:$0xff] }
 0x407   :  { %1372 = vmatpush.msrb.mxu2 %v1118_v47  ;;  %1395 = vmatpush.msra.mxu3 %v1134_v48  ;;  %v1214_v47 = vld [vmem:[%s3447_s16 + $0x3f0] sm:$0xff]  ;;  %v1183_v48 = vld [vmem:[%s3447_s16 + $0x2f8] sm:$0xff] }
 0x408   :  { %1350 = vmatpush.msrb.mxu1 %v1101_v49  ;;  %1419 = vmatpush.msra.mxu0 %v1149_v50  ;;  %v1199_v49 = vld [vmem:[%s3447_s16 + $0x378] sm:$0xff]  ;;  %v1165_v50 = vld [vmem:[%s3447_s16 + $0x268] sm:$0xff] }
 0x409   :  { %1373 = vmatpush.msrb.mxu2 %v1117_v51  ;;  %1396 = vmatpush.msra.mxu3 %v1133_v52  ;;  %v1213_v51 = vld [vmem:[%s3447_s16 + $0x3e8] sm:$0xff]  ;;  %v1182_v52 = vld [vmem:[%s3447_s16 + $0x2f0] sm:$0xff] }
 0x40a   :  { %1900 = vmatmul.msk.f32.gmra.mxu1 %vm134_vm1, %v2442_v18  ;;  %1902 = vmatmul.msk.f32.gmra.mxu2 %vm134_vm1, %v2442_v18 }
 0x40b   :  { %1904 = vmatmul.msk.f32.gmra.mxu3 %vm134_vm1, %v2442_v18  ;;  %1906 = vmatmul.msk.f32.gmra.mxu0 %vm134_vm1, %v2442_v18 }
 0x40c   :  { %1351 = vmatpush.msrb.mxu1 %v1100_v53  ;;  %1420 = vmatpush.msra.mxu0 %v1148_v54  ;;  %v1198_v53 = vld [vmem:[%s3447_s16 + $0x370] sm:$0xff]  ;;  %v1164_v54 = vld [vmem:[%s3447_s16 + $0x260] sm:$0xff] }
 0x40d   :  { %1374 = vmatpush.msrb.mxu2 %v1116_v55  ;;  %1397 = vmatpush.msra.mxu3 %v1132_v56  ;;  %v1212_v55 = vld [vmem:[%s3447_s16 + $0x3e0] sm:$0xff]  ;;  %v1181_v56 = vld [vmem:[%s3447_s16 + $0x2e8] sm:$0xff] }
 0x40e   :  { %1352 = vmatpush.msrb.mxu1 %v1099_v57  ;;  %1421 = vmatpush.msra.mxu0 %v1147_v58  ;;  %v1197_v57 = vld [vmem:[%s3447_s16 + $0x368] sm:$0xff]  ;;  %v1163_v58 = vld [vmem:[%s3447_s16 + $0x258] sm:$0xff] }
 0x40f   :  { %1375 = vmatpush.msrb.mxu2 %v1115_v59  ;;  %1398 = vmatpush.msra.mxu3 %v1131_v60  ;;  %v1211_v59 = vld [vmem:[%s3447_s16 + $0x3d8] sm:$0xff]  ;;  %v1180_v60 = vld [vmem:[%s3447_s16 + $0x2e0] sm:$0xff] }
 0x410   :  { %1353 = vmatpush.msrb.mxu1 %v1098_v61  ;;  %1422 = vmatpush.msra.mxu0 %v1146_v62  ;;  %v1196_v61 = vld [vmem:[%s3447_s16 + $0x360] sm:$0xff]  ;;  %v1162_v62 = vld [vmem:[%s3447_s16 + $0x250] sm:$0xff] }
 0x411   :  { %1376 = vmatpush.msrb.mxu2 %v1114_v63  ;;  %1399 = vmatpush.msra.mxu3 %v1130_v0  ;;  %v1210_v63 = vld [vmem:[%s3447_s16 + $0x3d0] sm:$0xff]  ;;  %v1179_v0 = vld [vmem:[%s3447_s16 + $0x2d8] sm:$0xff] }
 0x412   :  { %1907 = vmatmul.msk.f32.vlgmr.msra.gmra.mxu1 %vm134_vm1, %v2395_v2  ;;  %1909 = vmatmul.msk.f32.vlgmr.msra.gmra.mxu2 %vm134_vm1, %v2395_v2 }
 0x413   :  { %1911 = vmatmul.msk.f32.vlgmr.msrb.gmra.mxu3 %vm134_vm1, %v2395_v2  ;;  %1913 = vmatmul.msk.f32.vlgmr.msrb.gmra.mxu0 %vm134_vm1, %v2395_v2 }
 0x414   :  { %1354 = vmatpush.msrb.mxu1 %v1097_v20  ;;  %1423 = vmatpush.msra.mxu0 %v1145_v24  ;;  %v1195_v20 = vld [vmem:[%s3447_s16 + $0x358] sm:$0xff]  ;;  %v1161_v24 = vld [vmem:[%s3447_s16 + $0x248] sm:$0xff] }
 0x415   :  { %1377 = vmatpush.msrb.mxu2 %v1113_v4  ;;  %1400 = vmatpush.msra.mxu3 %v1129_v5  ;;  %v1209_v4 = vld [vmem:[%s3447_s16 + $0x3c8] sm:$0xff]  ;;  %v1178_v5 = vld [vmem:[%s3447_s16 + $0x2d0] sm:$0xff] }
 0x416   :  { %1355 = vmatpush.msrb.mxu1 %v1096_v3  ;;  %1424 = vmatpush.msra.mxu0 %v1144_v6  ;;  %v1194_v3 = vld [vmem:[%s3447_s16 + $0x350] sm:$0xff]  ;;  %v1160_v6 = vld [vmem:[%s3447_s16 + $0x240] sm:$0xff] }
 0x417   :  { %1378 = vmatpush.msrb.mxu2 %v1112_v8  ;;  %1401 = vmatpush.msra.mxu3 %v1128_v9  ;;  %v1208_v8 = vld [vmem:[%s3447_s16 + $0x3c0] sm:$0xff]  ;;  %v1177_v9 = vld [vmem:[%s3447_s16 + $0x2c8] sm:$0xff] }
 0x418   :  { %1356 = vmatpush.msrb.mxu1 %v1095_v10  ;;  %1425 = vmatpush.msra.mxu0 %v1143_v11  ;;  %v1193_v10 = vld [vmem:[%s3447_s16 + $0x348] sm:$0xff]  ;;  %v1159_v11 = vld [vmem:[%s3447_s16 + $0x238] sm:$0xff] }
 0x419   :  { %1379 = vmatpush.msrb.mxu2 %v1111_v12  ;;  %1402 = vmatpush.msra.mxu3 %v1127_v13  ;;  %v1207_v12 = vld [vmem:[%s3447_s16 + $0x3b8] sm:$0xff]  ;;  %v1176_v13 = vld [vmem:[%s3447_s16 + $0x2c0] sm:$0xff] }
 0x41a   :  { %1908 = vmatmul.msk.f32.gmra.mxu1 %vm134_vm1, %v2442_v18  ;;  %1910 = vmatmul.msk.f32.gmra.mxu2 %vm134_vm1, %v2442_v18 }
 0x41b   :  { %1912 = vmatmul.msk.f32.gmra.mxu3 %vm134_vm1, %v2442_v18  ;;  %1914 = vmatmul.msk.f32.gmra.mxu0 %vm134_vm1, %v2442_v18 }
 0x41c   :  { %1357 = vmatpush.msrb.mxu1 %v1094_v14  ;;  %1426 = vmatpush.msra.mxu0 %v1142_v7  ;;  %v1192_v14 = vld [vmem:[%s3447_s16 + $0x340] sm:$0xff]  ;;  %v1158_v7 = vld [vmem:[%s3447_s16 + $0x230] sm:$0xff] }
 0x41d   :  { %1380 = vmatpush.msrb.mxu2 %v1110_v15  ;;  %1403 = vmatpush.msra.mxu3 %v1126_v16  ;;  %v1206_v15 = vld [vmem:[%s3447_s16 + $0x3b0] sm:$0xff]  ;;  %v1175_v16 = vld [vmem:[%s3447_s16 + $0x2b8] sm:$0xff] }
 0x41e   :  { %1358 = vmatpush.msrb.mxu1 %v1093_v17  ;;  %1427 = vmatpush.msra.mxu0 %v1141_v19  ;;  %v1191_v17 = vld [vmem:[%s3447_s16 + $0x338] sm:$0xff]  ;;  %v1157_v19 = vld [vmem:[%s3447_s16 + $0x228] sm:$0xff] }
 0x41f   :  { %1381 = vmatpush.msrb.mxu2 %v1109_v21  ;;  %1404 = vmatpush.msra.mxu3 %v1125_v22  ;;  %v1205_v21 = vld [vmem:[%s3447_s16 + $0x3a8] sm:$0xff]  ;;  %v1174_v22 = vld [vmem:[%s3447_s16 + $0x2b0] sm:$0xff] }
 0x420   :  { %1359 = vmatpush.msrb.mxu1 %v1092_v23  ;;  %1428 = vmatpush.msra.mxu0 %v1140_v25  ;;  %v1190_v23 = vld [vmem:[%s3447_s16 + $0x330] sm:$0xff]  ;;  %v1156_v25 = vld [vmem:[%s3447_s16 + $0x220] sm:$0xff] }
 0x421   :  { %1382 = vmatpush.msrb.mxu2 %v1108_v26  ;;  %1405 = vmatpush.msra.mxu3 %v1124_v27  ;;  %v1204_v26 = vld [vmem:[%s3447_s16 + $0x3a0] sm:$0xff]  ;;  %v1155_v27 = vld [vmem:[%s3447_s16 + $0x218] sm:$0xff] }
 0x422   :  { %1360 = vmatpush.msrb.mxu1 %v1091_v28  ;;  %1429 = vmatpush.msra.mxu0 %v1139_v29  ;;  %v1203_v28 = vld [vmem:[%s3447_s16 + $0x398] sm:$0xff]  ;;  %v1173_v29 = vld [vmem:[%s3447_s16 + $0x2a8] sm:$0xff] }
 0x423   :  { %1383 = vmatpush.msrb.mxu2 %v1107_v30  ;;  %1406 = vmatpush.msra.mxu3 %v1123_v31  ;;  %v1189_v30 = vld [vmem:[%s3447_s16 + $0x328] sm:$0xff]  ;;  %v1154_v31 = vld [vmem:[%s3447_s16 + $0x210] sm:$0xff] }
 0x424   :  { %1361 = vmatpush.msrb.mxu1 %v1090_v32  ;;  %1430 = vmatpush.msra.mxu0 %v1138_v33  ;;  %v1202_v32 = vld [vmem:[%s3447_s16 + $0x390] sm:$0xff]  ;;  %v1172_v33 = vld [vmem:[%s3447_s16 + $0x2a0] sm:$0xff] }
 0x425   :  { %1384 = vmatpush.msrb.mxu2 %v1106_v34  ;;  %1407 = vmatpush.msra.mxu3 %v1122_v35  ;;  %v1188_v34 = vld [vmem:[%s3447_s16 + $0x320] sm:$0xff]  ;;  %v1153_v35 = vld [vmem:[%s3447_s16 + $0x208] sm:$0xff] }
 0x426   :  { %1362 = vmatpush.msrb.mxu1 %v1089_v36  ;;  %1431 = vmatpush.msra.mxu0 %v1137_v37  ;;  %v1201_v36 = vld [vmem:[%s3447_s16 + $0x388] sm:$0xff]  ;;  %v1171_v37 = vld [vmem:[%s3447_s16 + $0x298] sm:$0xff] }
 0x427   :  { %1385 = vmatpush.msrb.mxu2 %v1105_v38  ;;  %1408 = vmatpush.msra.mxu3 %v1121_v39  ;;  %v1187_v38 = vld [vmem:[%s3447_s16 + $0x318] sm:$0xff]  ;;  %v1152_v39 = vld [vmem:[%s3447_s16 + $0x200] sm:$0xff] }
 0x428   :  { %1363 = vmatpush.msrb.mxu1 %v1088_v40  ;;  %1432 = vmatpush.msra.mxu0 %v1136_v41  ;;  %v1200_v40 = vld [vmem:[%s3447_s16 + $0x380] sm:$0xff]  ;;  %v1170_v41 = vld [vmem:[%s3447_s16 + $0x290] sm:$0xff] }
 0x429   :  { %1386 = vmatpush.msrb.mxu2 %v1104_v44  ;;  %1409 = vmatpush.msra.mxu3 %v1120_v45  ;;  %v1185_v44 = vld [vmem:[%s3447_s16 + $0x308] sm:$0xff]  ;;  %v1168_v45 = vld [vmem:[%s3447_s16 + $0x280] sm:$0xff] }
 0x42a   :  { %1440 = vmatpush.msra.mxu1 %v1167_v42  ;;  %1509 = vmatpush.msrb.mxu0 %v1215_v43  ;;  %v1186_v42 = vld [vmem:[%s3447_s16 + $0x310] sm:$0xff]  ;;  %v1169_v43 = vld [vmem:[%s3447_s16 + $0x288] sm:$0xff] }
 0x42b   :  { %1463 = vmatpush.msra.mxu2 %v1183_v48  ;;  %1486 = vmatpush.msrb.mxu3 %v1199_v49 }
 0x42c   :  { %1441 = vmatpush.msra.mxu1 %v1166_v46  ;;  %1510 = vmatpush.msrb.mxu0 %v1214_v47  ;;  %v1184_v46 = vld [vmem:[%s3447_s16 + $0x300] sm:$0xff] }
 0x42d   :  { %1464 = vmatpush.msra.mxu2 %v1182_v52  ;;  %1487 = vmatpush.msrb.mxu3 %v1198_v53  ;;  %v2947_v47 = vld [vmem:[%s3446_s15] sm:$0xff] }
 0x42e   :  { %1442 = vmatpush.msra.mxu1 %v1165_v50  ;;  %1511 = vmatpush.msrb.mxu0 %v1213_v51  ;;  %v650_v48 = vperm.slane %v2947_v47, 0  ;;  %v653_v49 = vperm.slane %v2947_v47, 3 }
 0x42f   :  { %1465 = vmatpush.msra.mxu2 %v1181_v56  ;;  %1488 = vmatpush.msrb.mxu3 %v1197_v57  ;;  %v651_v56 = vperm.slane %v2947_v47, 1 }
 0x430   :  { %1443 = vmatpush.msra.mxu1 %v1164_v54  ;;  %1512 = vmatpush.msrb.mxu0 %v1212_v55  ;;  %v1231_v55 = vld [vmem:[%s3447_s16 + $0x478] sm:$0xff] }
 0x431   :  { %1466 = vmatpush.msra.mxu2 %v1180_v60  ;;  %1489 = vmatpush.msrb.mxu3 %v1196_v61  ;;  %v1230_v60 = vld [vmem:[%s3447_s16 + $0x470] sm:$0xff] }
 0x432   :  { %1444 = vmatpush.msra.mxu1 %v1163_v58  ;;  %1513 = vmatpush.msrb.mxu0 %v1211_v59  ;;  %v1279_v58 = vld [vmem:[%s3447_s16 + $0x5f8] sm:$0xff]  ;;  %v652_v59 = vperm.slane %v2947_v47, 2 }
 0x433   :  { %1467 = vmatpush.msra.mxu2 %v1179_v0  ;;  %1490 = vmatpush.msrb.mxu3 %v1195_v20  ;;  %v1229_v20 = vld [vmem:[%s3447_s16 + $0x468] sm:$0xff] }
 0x434   :  { %1445 = vmatpush.msra.mxu1 %v1162_v62  ;;  %1514 = vmatpush.msrb.mxu0 %v1210_v63  ;;  %v1278_v62 = vld [vmem:[%s3447_s16 + $0x5f0] sm:$0xff] }
 0x435   :  { %1468 = vmatpush.msra.mxu2 %v1178_v5  ;;  %1491 = vmatpush.msrb.mxu3 %v1194_v3  ;;  %v1277_v5 = vld [vmem:[%s3447_s16 + $0x5e8] sm:$0xff] }
 0x436   :  { %1446 = vmatpush.msra.mxu1 %v1161_v24  ;;  %1515 = vmatpush.msrb.mxu0 %v1209_v4 }
 0x437   :  { %1469 = vmatpush.msra.mxu2 %v1177_v9  ;;  %1492 = vmatpush.msrb.mxu3 %v1193_v10  ;;  %v1228_v9 = vld [vmem:[%s3447_s16 + $0x460] sm:$0xff] }
 0x438   :  { %1447 = vmatpush.msra.mxu1 %v1160_v6  ;;  %1516 = vmatpush.msrb.mxu0 %v1208_v8 }
 0x439   :  { %1470 = vmatpush.msra.mxu2 %v1176_v13  ;;  %1493 = vmatpush.msrb.mxu3 %v1192_v14  ;;  %v1263_v13 = vld [vmem:[%s3447_s16 + $0x578] sm:$0xff] }
 0x43a   :  { %1448 = vmatpush.msra.mxu1 %v1159_v11  ;;  %1517 = vmatpush.msrb.mxu0 %v1207_v12  ;;  %v1247_v12 = vld [vmem:[%s3447_s16 + $0x4f8] sm:$0xff] }
 0x43b   :  { %1471 = vmatpush.msra.mxu2 %v1175_v16  ;;  %1494 = vmatpush.msrb.mxu3 %v1191_v17  ;;  %v1227_v16 = vld [vmem:[%s3447_s16 + $0x458] sm:$0xff]  ;;  %v1246_v17 = vld [vmem:[%s3447_s16 + $0x4f0] sm:$0xff] }
 0x43c   :  { %1449 = vmatpush.msra.mxu1 %v1158_v7  ;;  %1518 = vmatpush.msrb.mxu0 %v1206_v15  ;;  %v1276_v7 = vld [vmem:[%s3447_s16 + $0x5e0] sm:$0xff] }
 0x43d   :  { %1472 = vmatpush.msra.mxu2 %v1174_v22  ;;  %1495 = vmatpush.msrb.mxu3 %v1190_v23  ;;  %v1275_v22 = vld [vmem:[%s3447_s16 + $0x5d8] sm:$0xff] }
 0x43e   :  { %1450 = vmatpush.msra.mxu1 %v1157_v19  ;;  %1519 = vmatpush.msrb.mxu0 %v1205_v21  ;;  %v1262_v19 = vld [vmem:[%s3447_s16 + $0x570] sm:$0xff]  ;;  %v654_v21 = vperm.slane %v2947_v47, 4 }
 0x43f   :  { %1473 = vmatpush.msra.mxu2 %v1173_v29  ;;  %1496 = vmatpush.msrb.mxu3 %v1189_v30  ;;  %v1245_v29 = vld [vmem:[%s3447_s16 + $0x4e8] sm:$0xff] }
 0x440   :  { %1451 = vmatpush.msra.mxu1 %v1156_v25  ;;  %1520 = vmatpush.msrb.mxu0 %v1204_v26  ;;  %v1226_v25 = vld [vmem:[%s3447_s16 + $0x450] sm:$0xff]  ;;  %v657_v26 = vperm.slane %v2947_v47, 7  ;;  %v1261_v30 = vld [vmem:[%s3447_s16 + $0x568] sm:$0xff] }
 0x441   :  { %1474 = vmatpush.msra.mxu2 %v1172_v33  ;;  %1497 = vmatpush.msrb.mxu3 %v1188_v34  ;;  %v1225_v34 = vld [vmem:[%s3447_s16 + $0x448] sm:$0xff] }
 0x442   :  { %1452 = vmatpush.msra.mxu1 %v1155_v27  ;;  %1521 = vmatpush.msrb.mxu0 %v1203_v28 }
 0x443   :  { %1475 = vmatpush.msra.mxu2 %v1171_v37  ;;  %1498 = vmatpush.msrb.mxu3 %v1187_v38  ;;  %v1244_v38 = vld [vmem:[%s3447_s16 + $0x4e0] sm:$0xff] }
 0x444   :  { %1453 = vmatpush.msra.mxu1 %v1154_v31  ;;  %1522 = vmatpush.msrb.mxu0 %v1202_v32  ;;  %v1274_v32 = vld [vmem:[%s3447_s16 + $0x5d0] sm:$0xff] }
 0x445   :  { %1476 = vmatpush.msra.mxu2 %v1170_v41  ;;  %1499 = vmatpush.msrb.mxu3 %v1186_v42  ;;  %v1273_v42 = vld [vmem:[%s3447_s16 + $0x5c8] sm:$0xff] }
 0x446   :  { %1454 = vmatpush.msra.mxu1 %v1153_v35  ;;  %1523 = vmatpush.msrb.mxu0 %v1201_v36 }
 0x447   :  { %1477 = vmatpush.msra.mxu2 %v1169_v43  ;;  %1500 = vmatpush.msrb.mxu3 %v1185_v44  ;;  %v1224_v43 = vld [vmem:[%s3447_s16 + $0x440] sm:$0xff]  ;;  %v655_v44 = vperm.slane %v2947_v47, 5 }
 0x448   :  { %1455 = vmatpush.msra.mxu1 %v1152_v39  ;;  %1524 = vmatpush.msrb.mxu0 %v1200_v40  ;;  %v1260_v39 = vld [vmem:[%s3447_s16 + $0x560] sm:$0xff] }
 0x449   :  { %1478 = vmatpush.msra.mxu2 %v1168_v45  ;;  %1501 = vmatpush.msrb.mxu3 %v1184_v46  ;;  %v1243_v46 = vld [vmem:[%s3447_s16 + $0x4d8] sm:$0xff] }
 0x45f   :  { %v705_v50 = vpop.f32.mrf.mxu1 }
 0x460   :  { %v706_v51 = vadd.f32 %v705_v50, %v650_v48  ;;  %v774_v52 = vpop.f32.mrf.mxu0 }
 0x461   :  { %v775_v53 = vadd.f32 %v774_v52, %v653_v49  ;;  %v1223_v52 = vld [vmem:[%s3447_s16 + $0x438] sm:$0xff] }
 0x462   :  { %v1056_v54 = vmax.f32 %v706_v51, 0.0  ;;  %v1272_v51 = vld [vmem:[%s3447_s16 + $0x5c0] sm:$0xff] }
 0x463   :  { %v1059_v57 = vmax.f32 %v775_v53, 0.0 }
 0x464   :  { %1364 = vmatmul.f32.vlgmr.msrb.gmra.mxu1 %v1056_v54  ;;  %v1242_v54 = vld [vmem:[%s3447_s16 + $0x4d0] sm:$0xff] }
 0x465   :  { %1433 = vmatmul.f32.vlgmr.msra.gmra.mxu0 %v1059_v57  ;;  %1532 = vmatpush.msrb.mxu1 %v1231_v55  ;;  %v728_v61 = vpop.f32.mrf.mxu2  ;;  %v1258_v55 = vld [vmem:[%s3447_s16 + $0x550] sm:$0xff] }
 0x466   :  { %1601 = vmatpush.msra.mxu0 %v1279_v58  ;;  %v729_v63 = vadd.f32 %v728_v61, %v651_v56  ;;  %v751_v0 = vpop.f32.mrf.mxu3  ;;  %v1271_v58 = vld [vmem:[%s3447_s16 + $0x5b8] sm:$0xff] }
 0x467   :  { %v752_v24 = vadd.f32 %v751_v0, %v652_v59  ;;  %1533 = vmatpush.msrb.mxu1 %v1230_v60  ;;  %v708_v4 = vpop.f32.mrf.mxu1  ;;  %v1222_v60 = vld [vmem:[%s3447_s16 + $0x430] sm:$0xff] }
 0x468   :  { %v1057_v3 = vmax.f32 %v729_v63, 0.0  ;;  %1602 = vmatpush.msra.mxu0 %v1278_v62  ;;  %v709_v6 = vadd.f32 %v708_v4, %v650_v48  ;;  %v777_v8 = vpop.f32.mrf.mxu0  ;;  %v1259_v48 = vld [vmem:[%s3447_s16 + $0x558] sm:$0xff]  ;;  %v1241_v62 = vld [vmem:[%s3447_s16 + $0x4c8] sm:$0xff] }
 0x469   :  { %v1058_v10 = vmax.f32 %v752_v24, 0.0  ;;  %v778_v11 = vadd.f32 %v777_v8, %v653_v49  ;;  %1534 = vmatpush.msrb.mxu1 %v1229_v20  ;;  %v656_v49 = vperm.slane %v2947_v47, 6  ;;  %v1257_v63 = vld [vmem:[%s3447_s16 + $0x548] sm:$0xff]  ;;  %v1270_v20 = vld [vmem:[%s3447_s16 + $0x5b0] sm:$0xff]  ;;  %v1256_v8 = vld [vmem:[%s3447_s16 + $0x540] sm:$0xff] }
 0x46a   :  { %v1072_v14 = vmax.f32 %v709_v6, 0.0  ;;  %1603 = vmatpush.msra.mxu0 %v1277_v5  ;;  %1387 = vmatmul.f32.vlgmr.msrb.gmra.mxu2 %v1057_v3  ;;  %v1221_v4 = vld [vmem:[%s3447_s16 + $0x428] sm:$0xff]  ;;  %v1240_v6 = vld [vmem:[%s3447_s16 + $0x4c0] sm:$0xff]  ;;  %v1266_v47 = vld [vmem:[%s3447_s16 + $0x590] sm:$0xff] }
 0x46b   :  { %v1075_v15 = vmax.f32 %v778_v11, 0.0  ;;  %1410 = vmatmul.f32.vlgmr.msra.gmra.mxu3 %v1058_v10  ;;  %1535 = vmatpush.msrb.mxu1 %v1228_v9  ;;  %v1269_v10 = vld [vmem:[%s3447_s16 + $0x5a8] sm:$0xff]  ;;  %v1220_v11 = vld [vmem:[%s3447_s16 + $0x420] sm:$0xff] }
 0x46c   :  { %1555 = vmatpush.msrb.mxu2 %v1247_v12  ;;  %1578 = vmatpush.msra.mxu3 %v1263_v13  ;;  %v1239_v13 = vld [vmem:[%s3447_s16 + $0x4b8] sm:$0xff] }
 0x46d   :  { %1604 = vmatpush.msra.mxu0 %v1276_v7  ;;  %1367 = vmatmul.f32.gmra.mxu1 %v1072_v14  ;;  %v731_v23 = vpop.f32.mrf.mxu2  ;;  %v1255_v14 = vld [vmem:[%s3447_s16 + $0x538] sm:$0xff] }
 0x46e   :  { %1436 = vmatmul.f32.gmra.mxu0 %v1075_v15  ;;  %1536 = vmatpush.msrb.mxu1 %v1227_v16  ;;  %v732_v27 = vadd.f32 %v731_v23, %v651_v56  ;;  %v754_v28 = vpop.f32.mrf.mxu3  ;;  %v3095_v15 = vld [vmem:[%s3446_s15 + $0x8] sm:$0xff]  ;;  %v1254_v23 = vld [vmem:[%s3447_s16 + $0x530] sm:$0xff] }
 0x46f   :  { %1556 = vmatpush.msrb.mxu2 %v1246_v17  ;;  %1579 = vmatpush.msra.mxu3 %v1262_v19  ;;  %v755_v31 = vadd.f32 %v754_v28, %v652_v59  ;;  %v797_v33 = vpop.f32.mrf.mxu1  ;;  %v1268_v17 = vld [vmem:[%s3447_s16 + $0x5a0] sm:$0xff] }
 0x470   :  { %1605 = vmatpush.msra.mxu0 %v1275_v22  ;;  %v1073_v35 = vmax.f32 %v732_v27, 0.0  ;;  %1537 = vmatpush.msrb.mxu1 %v1226_v25  ;;  %v798_v36 = vadd.f32 %v797_v33, %v654_v21  ;;  %v866_v37 = vpop.f32.mrf.mxu0  ;;  %v1238_v22 = vld [vmem:[%s3447_s16 + $0x4b0] sm:$0xff]  ;;  %v1267_v27 = vld [vmem:[%s3447_s16 + $0x598] sm:$0xff]  ;;  %v661_v33 = vperm.slane %v3095_v15, 3 }
 0x471   :  { %v1074_v40 = vmax.f32 %v755_v31, 0.0  ;;  %1557 = vmatpush.msrb.mxu2 %v1245_v29  ;;  %1580 = vmatpush.msra.mxu3 %v1261_v30  ;;  %v867_v41 = vadd.f32 %v866_v37, %v657_v26  ;;  %v1218_v29 = vld [vmem:[%s3447_s16 + $0x410] sm:$0xff]  ;;  %v1237_v31 = vld [vmem:[%s3447_s16 + $0x4a8] sm:$0xff] }
 0x472   :  { %1606 = vmatpush.msra.mxu0 %v1274_v32  ;;  %1538 = vmatpush.msrb.mxu1 %v1225_v34  ;;  %v1060_v45 = vmax.f32 %v798_v36, 0.0  ;;  %v1253_v32 = vld [vmem:[%s3447_s16 + $0x528] sm:$0xff] }
 0x473   :  { %1558 = vmatpush.msrb.mxu2 %v1244_v38  ;;  %1581 = vmatpush.msra.mxu3 %v1260_v39  ;;  %v1063_v50 = vmax.f32 %v867_v41, 0.0  ;;  %v1236_v38 = vld [vmem:[%s3447_s16 + $0x4a0] sm:$0xff]  ;;  %v1265_v41 = vld [vmem:[%s3447_s16 + $0x588] sm:$0xff] }
 0x474   :  { %1607 = vmatpush.msra.mxu0 %v1273_v42  ;;  %1390 = vmatmul.f32.gmra.mxu2 %v1073_v35  ;;  %v1217_v35 = vld [vmem:[%s3447_s16 + $0x408] sm:$0xff]  ;;  %v1252_v39 = vld [vmem:[%s3447_s16 + $0x520] sm:$0xff] }
 0x475   :  { %1413 = vmatmul.f32.gmra.mxu3 %v1074_v40  ;;  %1539 = vmatpush.msrb.mxu1 %v1224_v43  ;;  %v820_v53 = vpop.f32.mrf.mxu2  ;;  %v1216_v43 = vld [vmem:[%s3447_s16 + $0x400] sm:$0xff] }
 0x476   :  { %1559 = vmatpush.msrb.mxu2 %v1243_v46  ;;  %1582 = vmatpush.msra.mxu3 %v1259_v48  ;;  %v821_v56 = vadd.f32 %v820_v53, %v655_v44  ;;  %v843_v57 = vpop.f32.mrf.mxu3  ;;  %v1264_v48 = vld [vmem:[%s3447_s16 + $0x580] sm:$0xff]  ;;  %v660_v53 = vperm.slane %v3095_v15, 2 }
 0x477   :  { %1608 = vmatpush.msra.mxu0 %v1272_v51  ;;  %1456 = vmatmul.f32.vlgmr.msra.gmra.mxu1 %v1060_v45  ;;  %v844_v59 = vadd.f32 %v843_v57, %v656_v49  ;;  %v800_v61 = vpop.f32.mrf.mxu1  ;;  %v1251_v45 = vld [vmem:[%s3447_s16 + $0x518] sm:$0xff] }
 0x478   :  { %1525 = vmatmul.f32.vlgmr.msrb.gmra.mxu0 %v1063_v50  ;;  %1540 = vmatpush.msrb.mxu1 %v1223_v52  ;;  %v869_v0 = vpop.f32.mrf.mxu0  ;;  %v801_v24 = vadd.f32 %v800_v61, %v654_v21  ;;  %v1061_v5 = vmax.f32 %v821_v56, 0.0  ;;  %v1219_v21 = vld [vmem:[%s3447_s16 + $0x418] sm:$0xff]  ;;  %v659_v50 = vperm.slane %v3095_v15, 1  ;;  %v1250_v56 = vld [vmem:[%s3447_s16 + $0x510] sm:$0xff]  ;;  %v1233_v61 = vld [vmem:[%s3447_s16 + $0x488] sm:$0xff] }
 0x479   :  { %1560 = vmatpush.msrb.mxu2 %v1242_v54  ;;  %1583 = vmatpush.msra.mxu3 %v1258_v55  ;;  %v870_v3 = vadd.f32 %v869_v0, %v657_v26  ;;  %v1062_v9 = vmax.f32 %v844_v59, 0.0  ;;  %v658_v26 = vperm.slane %v3095_v15, 0  ;;  %v1343_v51 = vld [vmem:[%s3447_s16 + $0x7f8] sm:$0xff]  ;;  %v1234_v55 = vld [vmem:[%s3447_s16 + $0x490] sm:$0xff]  ;;  %v1249_v0 = vld [vmem:[%s3447_s16 + $0x508] sm:$0xff] }
 0x47a   :  { %1609 = vmatpush.msra.mxu0 %v1271_v58  ;;  %1541 = vmatpush.msrb.mxu1 %v1222_v60  ;;  %v1076_v12 = vmax.f32 %v801_v24, 0.0  ;;  %v1294_v58 = vld [vmem:[%s3447_s16 + $0x670] sm:$0xff]  ;;  %v1293_v24 = vld [vmem:[%s3447_s16 + $0x668] sm:$0xff] }
 0x47b   :  { %1561 = vmatpush.msrb.mxu2 %v1241_v62  ;;  %1584 = vmatpush.msra.mxu3 %v1257_v63  ;;  %v1079_v16 = vmax.f32 %v870_v3, 0.0  ;;  %v1342_v60 = vld [vmem:[%s3447_s16 + $0x7f0] sm:$0xff] }
 0x47c   :  { %1610 = vmatpush.msra.mxu0 %v1270_v20  ;;  %1542 = vmatpush.msrb.mxu1 %v1221_v4  ;;  %v1341_v4 = vld [vmem:[%s3447_s16 + $0x7e8] sm:$0xff] }
 0x47d   :  { %1562 = vmatpush.msrb.mxu2 %v1240_v6  ;;  %1585 = vmatpush.msra.mxu3 %v1256_v8  ;;  %v823_v7 = vpop.f32.mrf.mxu2  ;;  %v1248_v6 = vld [vmem:[%s3447_s16 + $0x500] sm:$0xff] }
 0x47e   :  { %1611 = vmatpush.msra.mxu0 %v1269_v10  ;;  %1479 = vmatmul.f32.vlgmr.msra.gmra.mxu2 %v1061_v5  ;;  %v846_v19 = vpop.f32.mrf.mxu3  ;;  %v824_v25 = vadd.f32 %v823_v7, %v655_v44  ;;  %v1235_v44 = vld [vmem:[%s3447_s16 + $0x498] sm:$0xff]  ;;  %v1232_v5 = vld [vmem:[%s3447_s16 + $0x480] sm:$0xff] }
 0x47f   :  { %1502 = vmatmul.f32.vlgmr.msrb.gmra.mxu3 %v1062_v9  ;;  %1543 = vmatpush.msrb.mxu1 %v1220_v11  ;;  %v847_v28 = vadd.f32 %v846_v19, %v656_v49  ;;  %v889_v30 = vpop.f32.mrf.mxu1  ;;  %v1295_v49 = vld [vmem:[%s3447_s16 + $0x678] sm:$0xff]  ;;  %v1292_v8 = vld [vmem:[%s3447_s16 + $0x660] sm:$0xff]  ;;  %v1326_v19 = vld [vmem:[%s3447_s16 + $0x770] sm:$0xff] }
 0x480   :  { %1563 = vmatpush.msrb.mxu2 %v1239_v13  ;;  %1586 = vmatpush.msra.mxu3 %v1255_v14  ;;  %v958_v34 = vpop.f32.mrf.mxu0  ;;  %v1077_v36 = vmax.f32 %v824_v25, 0.0  ;;  %v890_v37 = vadd.f32 %v889_v30, %v658_v26  ;;  %v1311_v11 = vld [vmem:[%s3447_s16 + $0x6f8] sm:$0xff]  ;;  %v1340_v14 = vld [vmem:[%s3447_s16 + $0x7e0] sm:$0xff] }
 0x481   :  { %1612 = vmatpush.msra.mxu0 %v1268_v17  ;;  %1459 = vmatmul.f32.gmra.mxu1 %v1076_v12  ;;  %v1078_v40 = vmax.f32 %v847_v28, 0.0  ;;  %v959_v42 = vadd.f32 %v958_v34, %v661_v33  ;;  %v1327_v12 = vld [vmem:[%s3447_s16 + $0x778] sm:$0xff]  ;;  %v1310_v17 = vld [vmem:[%s3447_s16 + $0x6f0] sm:$0xff]  ;;  %v1309_v28 = vld [vmem:[%s3447_s16 + $0x6e8] sm:$0xff] }
 0x482   :  { %1528 = vmatmul.f32.gmra.mxu0 %v1079_v16  ;;  %1544 = vmatpush.msrb.mxu1 %v1219_v21  ;;  %v1064_v46 = vmax.f32 %v890_v37, 0.0  ;;  %v1291_v7 = vld [vmem:[%s3447_s16 + $0x658] sm:$0xff]  ;;  %v1337_v34 = vld [vmem:[%s3447_s16 + $0x7c8] sm:$0xff] }
 0x483   :  { %1564 = vmatpush.msrb.mxu2 %v1238_v22  ;;  %1587 = vmatpush.msra.mxu3 %v1254_v23  ;;  %v1067_v54 = vmax.f32 %v959_v42, 0.0  ;;  %v1339_v23 = vld [vmem:[%s3447_s16 + $0x7d8] sm:$0xff]  ;;  %v1306_v42 = vld [vmem:[%s3447_s16 + $0x6d0] sm:$0xff] }
 0x484   :  { %1613 = vmatpush.msra.mxu0 %v1267_v27  ;;  %1545 = vmatpush.msrb.mxu1 %v1218_v29  ;;  %v1325_v29 = vld [vmem:[%s3447_s16 + $0x768] sm:$0xff]  ;;  %v1307_v37 = vld [vmem:[%s3447_s16 + $0x6d8] sm:$0xff] }
 0x485   :  { %1565 = vmatpush.msrb.mxu2 %v1237_v31  ;;  %1588 = vmatpush.msra.mxu3 %v1253_v32  ;;  %v912_v52 = vpop.f32.mrf.mxu2  ;;  %v1338_v31 = vld [vmem:[%s3447_s16 + $0x7d0] sm:$0xff]  ;;  %v1289_v32 = vld [vmem:[%s3447_s16 + $0x648] sm:$0xff] }
 0x486   :  { %1614 = vmatpush.msra.mxu0 %v1266_v47  ;;  %1546 = vmatpush.msrb.mxu1 %v1217_v35  ;;  %v935_v57 = vpop.f32.mrf.mxu3  ;;  %v913_v59 = vadd.f32 %v912_v52, %v659_v50  ;;  %v1324_v47 = vld [vmem:[%s3447_s16 + $0x760] sm:$0xff] }
 0x487   :  { %1566 = vmatpush.msrb.mxu2 %v1236_v38  ;;  %1589 = vmatpush.msra.mxu3 %v1252_v39  ;;  %v892_v62 = vpop.f32.mrf.mxu1  ;;  %v936_v63 = vadd.f32 %v935_v57, %v660_v53  ;;  %v1288_v35 = vld [vmem:[%s3447_s16 + $0x640] sm:$0xff]  ;;  %v1323_v38 = vld [vmem:[%s3447_s16 + $0x758] sm:$0xff] }
 0x488   :  { %1615 = vmatpush.msra.mxu0 %v1265_v41  ;;  %1482 = vmatmul.f32.gmra.mxu2 %v1077_v36  ;;  %v961_v20 = vpop.f32.mrf.mxu0  ;;  %v893_v3 = vadd.f32 %v892_v62, %v658_v26  ;;  %v1065_v9 = vmax.f32 %v913_v59, 0.0  ;;  %v1290_v26 = vld [vmem:[%s3447_s16 + $0x650] sm:$0xff]  ;;  %v1287_v41 = vld [vmem:[%s3447_s16 + $0x638] sm:$0xff]  ;;  %v1320_v52 = vld [vmem:[%s3447_s16 + $0x740] sm:$0xff] }
 0x489   :  { %1505 = vmatmul.f32.gmra.mxu3 %v1078_v40  ;;  %1547 = vmatpush.msrb.mxu1 %v1216_v43  ;;  %v962_v10 = vadd.f32 %v961_v20, %v661_v33  ;;  %v1066_v13 = vmax.f32 %v936_v63, 0.0  ;;  %v1308_v33 = vld [vmem:[%s3447_s16 + $0x6e0] sm:$0xff]  ;;  %v1322_v43 = vld [vmem:[%s3447_s16 + $0x750] sm:$0xff]  ;;  %v1283_v59 = vld [vmem:[%s3447_s16 + $0x618] sm:$0xff] }
 0x48a   :  { %1567 = vmatpush.msrb.mxu2 %v1235_v44  ;;  %1590 = vmatpush.msra.mxu3 %v1251_v45  ;;  %v1080_v16 = vmax.f32 %v893_v3, 0.0  ;;  %v1336_v40 = vld [vmem:[%s3447_s16 + $0x7c0] sm:$0xff]  ;;  %v1335_v44 = vld [vmem:[%s3447_s16 + $0x7b8] sm:$0xff]  ;;  %v1286_v45 = vld [vmem:[%s3447_s16 + $0x630] sm:$0xff] }
 0x48b   :  { %1616 = vmatpush.msra.mxu0 %v1264_v48  ;;  %1624 = vmatpush.msra.mxu1 %v1295_v49  ;;  %v1083_v22 = vmax.f32 %v962_v10, 0.0  ;;  %v1321_v48 = vld [vmem:[%s3447_s16 + $0x748] sm:$0xff]  ;;  %v1334_v49 = vld [vmem:[%s3447_s16 + $0x7b0] sm:$0xff]  ;;  %v1331_v20 = vld [vmem:[%s3447_s16 + $0x798] sm:$0xff] }
 0x48c   :  { %1548 = vmatmul.f32.vlgmr.msrb.gmra.mxu1 %v1064_v46  ;;  %1568 = vmatpush.msrb.mxu2 %v1234_v55  ;;  %v1305_v46 = vld [vmem:[%s3447_s16 + $0x6c8] sm:$0xff]  ;;  %v1303_v55 = vld [vmem:[%s3447_s16 + $0x6b8] sm:$0xff]  ;;  %v1302_v62 = vld [vmem:[%s3447_s16 + $0x6b0] sm:$0xff] }
 0x48d   :  { %1693 = vmatpush.msrb.mxu0 %v1343_v51  ;;  %1591 = vmatpush.msra.mxu3 %v1250_v56  ;;  %v915_v21 = vpop.f32.mrf.mxu2  ;;  %v1304_v51 = vld [vmem:[%s3447_s16 + $0x6c0] sm:$0xff]  ;;  %v1319_v56 = vld [vmem:[%s3447_s16 + $0x738] sm:$0xff]  ;;  %v1318_v63 = vld [vmem:[%s3447_s16 + $0x730] sm:$0xff] }
 0x48e   :  { %1617 = vmatmul.f32.vlgmr.msra.gmra.mxu0 %v1067_v54  ;;  %1625 = vmatpush.msra.mxu1 %v1294_v58  ;;  %v938_v25 = vpop.f32.mrf.mxu3  ;;  %v916_v27 = vadd.f32 %v915_v21, %v659_v50  ;;  %v1285_v50 = vld [vmem:[%s3447_s16 + $0x628] sm:$0xff]  ;;  %v1284_v54 = vld [vmem:[%s3447_s16 + $0x620] sm:$0xff]  ;;  %v1330_v3 = vld [vmem:[%s3447_s16 + $0x790] sm:$0xff]  ;;  %v664_v21 = vperm.slane %v3095_v15, 6 }
 0x48f   :  { %1694 = vmatpush.msrb.mxu0 %v1342_v60  ;;  %1569 = vmatpush.msrb.mxu2 %v1233_v61  ;;  %v939_v30 = vadd.f32 %v938_v25, %v660_v53  ;;  %v1333_v53 = vld [vmem:[%s3447_s16 + $0x7a8] sm:$0xff]  ;;  %v981_v57 = vpop.f32.mrf.mxu1  ;;  %v1332_v58 = vld [vmem:[%s3447_s16 + $0x7a0] sm:$0xff]  ;;  %v662_v60 = vperm.slane %v3095_v15, 4  ;;  %v1298_v25 = vld [vmem:[%s3447_s16 + $0x690] sm:$0xff] }
 0x490   :  { %1592 = vmatpush.msra.mxu3 %v1249_v0  ;;  %1626 = vmatpush.msra.mxu1 %v1293_v24  ;;  %v1081_v36 = vmax.f32 %v916_v27, 0.0  ;;  %v1050_v61 = vpop.f32.mrf.mxu0  ;;  %v665_v0 = vperm.slane %v3095_v15, 7  ;;  %v1282_v24 = vld [vmem:[%s3447_s16 + $0x610] sm:$0xff]  ;;  %v1316_v10 = vld [vmem:[%s3447_s16 + $0x720] sm:$0xff] }
 0x491   :  { %1695 = vmatpush.msrb.mxu0 %v1341_v4  ;;  %1570 = vmatpush.msrb.mxu2 %v1232_v5  ;;  %v1082_v39 = vmax.f32 %v939_v30, 0.0  ;;  %v1301_v4 = vld [vmem:[%s3447_s16 + $0x6a8] sm:$0xff] }
 0x492   :  { %1593 = vmatpush.msra.mxu3 %v1248_v6  ;;  %1627 = vmatpush.msra.mxu1 %v1292_v8  ;;  %v1317_v5 = vld [vmem:[%s3447_s16 + $0x728] sm:$0xff]  ;;  %v982_v8 = vadd.f32 %v981_v57, %v662_v60  ;;  %v1929_v57 = vld [vmem:[%s3448_s17] ss:$0 sm:$0xff] }
 0x493   :  { %1647 = vmatpush.msra.mxu2 %v1311_v11  ;;  %1696 = vmatpush.msrb.mxu0 %v1340_v14  ;;  %v1281_v6 = vld [vmem:[%s3447_s16 + $0x608] sm:$0xff]  ;;  %v1051_v11 = vadd.f32 %v1050_v61, %v665_v0  ;;  %v1280_v14 = vld [vmem:[%s3447_s16 + $0x600] sm:$0xff] }
 0x494   :  { %1670 = vmatpush.msrb.mxu3 %v1327_v12  ;;  %1571 = vmatmul.f32.vlgmr.msrb.gmra.mxu2 %v1065_v9  ;;  %v1300_v9 = vld [vmem:[%s3447_s16 + $0x6a0] sm:$0xff]  ;;  %v1297_v30 = vld [vmem:[%s3447_s16 + $0x688] sm:$0xff] }
 0x495   :  { %1594 = vmatmul.f32.vlgmr.msra.gmra.mxu3 %v1066_v13  ;;  %1628 = vmatpush.msra.mxu1 %v1291_v7  ;;  %v1004_v12 = vpop.f32.mrf.mxu2  ;;  %v1329_v13 = vld [vmem:[%s3447_s16 + $0x788] sm:$0xff]  ;;  %v663_v7 = vperm.slane %v3095_v15, 5  ;;  %v1314_v15 = vld [vmem:[%s3447_s16 + $0x710] sm:$0xff] }
 0x496   :  { %1648 = vmatpush.msra.mxu2 %v1310_v17  ;;  %1671 = vmatpush.msrb.mxu3 %v1326_v19  ;;  %v1299_v17 = vld [vmem:[%s3447_s16 + $0x698] sm:$0xff] }
 0x497   :  { %1697 = vmatpush.msrb.mxu0 %v1339_v23  ;;  %1551 = vmatmul.f32.gmra.mxu1 %v1080_v16  ;;  %v1027_v16 = vpop.f32.mrf.mxu3  ;;  %v1315_v19 = vld [vmem:[%s3447_s16 + $0x718] sm:$0xff]  ;;  %v1068_v23 = vmax.f32 %v982_v8, 0.0  ;;  %v984_v27 = vpop.f32.mrf.mxu1 }
 0x498   :  { %1620 = vmatmul.f32.gmra.mxu0 %v1083_v22  ;;  %1629 = vmatpush.msra.mxu1 %v1290_v26  ;;  %v1328_v22 = vld [vmem:[%s3447_s16 + $0x780] sm:$0xff]  ;;  %v1071_v26 = vmax.f32 %v1051_v11, 0.0 }
 0x499   :  { %1649 = vmatpush.msra.mxu2 %v1309_v28  ;;  %1672 = vmatpush.msrb.mxu3 %v1325_v29  ;;  %v1005_v28 = vadd.f32 %v1004_v12, %v663_v7  ;;  %v1053_v29 = vpop.f32.mrf.mxu0 }
 0x49a   :  { %1698 = vmatpush.msrb.mxu0 %v1338_v31  ;;  %1630 = vmatpush.msra.mxu1 %v1289_v32  ;;  %v1028_v31 = vadd.f32 %v1027_v16, %v664_v21  ;;  %v1313_v32 = vld [vmem:[%s3447_s16 + $0x708] sm:$0xff] }
 0x49b   :  { %1650 = vmatpush.msra.mxu2 %v1308_v33  ;;  %1673 = vmatpush.msrb.mxu3 %v1324_v47  ;;  %v985_v33 = vadd.f32 %v984_v27, %v662_v60  ;;  %v1296_v47 = vld [vmem:[%s3447_s16 + $0x680] sm:$0xff] }
 0x49c   :  { %1699 = vmatpush.msrb.mxu0 %v1337_v34  ;;  %1631 = vmatpush.msra.mxu1 %v1288_v35  ;;  %v1054_v34 = vadd.f32 %v1053_v29, %v665_v0  ;;  %v1312_v35 = vld [vmem:[%s3447_s16 + $0x700] sm:$0xff] }
 0x49d   :  { %1651 = vmatpush.msra.mxu2 %v1307_v37  ;;  %1674 = vmatpush.msrb.mxu3 %v1323_v38  ;;  %v1070_v37 = vmax.f32 %v1028_v31, 0.0  ;;  %v1007_v38 = vpop.f32.mrf.mxu2 }
 0x49e   :  { %1700 = vmatpush.msrb.mxu0 %v1336_v40  ;;  %1574 = vmatmul.f32.gmra.mxu2 %v1081_v36  ;;  %v1069_v36 = vmax.f32 %v1005_v28, 0.0 }
 0x49f   :  { %1597 = vmatmul.f32.gmra.mxu3 %v1082_v39  ;;  %1632 = vmatpush.msra.mxu1 %v1287_v41  ;;  %v1084_v39 = vmax.f32 %v985_v33, 0.0  ;;  %v1030_v40 = vpop.f32.mrf.mxu3  ;;  %v1087_v41 = vmax.f32 %v1054_v34, 0.0 }
 0x4a0   :  { %1652 = vmatpush.msra.mxu2 %v1306_v42  ;;  %1675 = vmatpush.msrb.mxu3 %v1322_v43  ;;  %v1008_v42 = vadd.f32 %v1007_v38, %v663_v7  ;;  %v1031_v43 = vadd.f32 %v1030_v40, %v664_v21 }
 0x4a1   :  { %1701 = vmatpush.msrb.mxu0 %v1335_v44  ;;  %1633 = vmatpush.msra.mxu1 %v1286_v45 }
 0x4a2   :  { %1653 = vmatpush.msra.mxu2 %v1305_v46  ;;  %1676 = vmatpush.msrb.mxu3 %v1321_v48  ;;  %v1085_v44 = vmax.f32 %v1008_v42, 0.0  ;;  %v1086_v45 = vmax.f32 %v1031_v43, 0.0 }
 0x4a3   :  { %1702 = vmatpush.msrb.mxu0 %v1334_v49  ;;  %1634 = vmatpush.msra.mxu1 %v1285_v50 }
 0x4a4   :  { %1654 = vmatpush.msra.mxu2 %v1304_v51  ;;  %1677 = vmatpush.msrb.mxu3 %v1320_v52 }
 0x4a5   :  { %1703 = vmatpush.msrb.mxu0 %v1333_v53  ;;  %1635 = vmatpush.msra.mxu1 %v1284_v54 }
 0x4a6   :  { %1655 = vmatpush.msra.mxu2 %v1303_v55  ;;  %1678 = vmatpush.msrb.mxu3 %v1319_v56 }
 0x4a7   :  { %1704 = vmatpush.msrb.mxu0 %v1332_v58  ;;  %1636 = vmatpush.msra.mxu1 %v1283_v59 }
 0x4a8   :  { %1656 = vmatpush.msra.mxu2 %v1302_v62  ;;  %1679 = vmatpush.msrb.mxu3 %v1318_v63 }
 0x4a9   :  { %1705 = vmatpush.msrb.mxu0 %v1331_v20  ;;  %1637 = vmatpush.msra.mxu1 %v1282_v24 }
 0x4aa   :  { %1657 = vmatpush.msra.mxu2 %v1301_v4  ;;  %1680 = vmatpush.msrb.mxu3 %v1317_v5 }
 0x4ab   :  { %1706 = vmatpush.msrb.mxu0 %v1330_v3  ;;  %1638 = vmatpush.msra.mxu1 %v1281_v6 }
 0x4ac   :  { %1658 = vmatpush.msra.mxu2 %v1300_v9  ;;  %1681 = vmatpush.msrb.mxu3 %v1316_v10 }
 0x4ad   :  { %1707 = vmatpush.msrb.mxu0 %v1329_v13  ;;  %1639 = vmatpush.msra.mxu1 %v1280_v14 }
 0x4ae   :  { %1659 = vmatpush.msra.mxu2 %v1299_v17  ;;  %1682 = vmatpush.msrb.mxu3 %v1315_v19 }
 0x4af   :  { %1708 = vmatpush.msrb.mxu0 %v1328_v22  ;;  %1640 = vmatmul.f32.vlgmr.msra.gmra.mxu1 %v1068_v23 }
 0x4b0   :  { %1709 = vmatmul.f32.vlgmr.msrb.gmra.mxu0 %v1071_v26  ;;  %1660 = vmatpush.msra.mxu2 %v1298_v25 }
 0x4b1   :  { %1683 = vmatpush.msrb.mxu3 %v1314_v15 }
 0x4b2   :  { %1661 = vmatpush.msra.mxu2 %v1297_v30 }
 0x4b3   :  { %1684 = vmatpush.msrb.mxu3 %v1313_v32 }
 0x4b4   :  { %1662 = vmatpush.msra.mxu2 %v1296_v47 }
 0x4b5   :  { %1685 = vmatpush.msrb.mxu3 %v1312_v35  ;;  %1663 = vmatmul.f32.vlgmr.msra.gmra.mxu2 %v1069_v36 }
 0x4b6   :  { %1686 = vmatmul.f32.vlgmr.msrb.gmra.mxu3 %v1070_v37 }
 0x4b7   :  { %1643 = vmatmul.f32.gmra.mxu1 %v1084_v39 }
 0x4b8   :  { %1712 = vmatmul.f32.gmra.mxu0 %v1087_v41 }
 0x4bd   :  { %1666 = vmatmul.f32.gmra.mxu2 %v1085_v44 }
 0x4be   :  { %1689 = vmatmul.f32.gmra.mxu3 %v1086_v45 }
 0x4e1   :  { %v1365_v46 = vpop.f32.mrf.mxu1 }
 0x4e2   :  { %v1434_v50 = vpop.f32.mrf.mxu0  ;;  %v1366_v61 = vadd.f32 %v1929_v57, %v1365_v46 }
 0x4ea   :  { %v1368_v51 = vpop.f32.mrf.mxu1 }
 0x4eb   :  { %v1437_v54 = vpop.f32.mrf.mxu0  ;;  %v1369_v62 = vadd.f32 %v1929_v57, %v1368_v51 }
 0x4ed   :  { %v1388_v48 = vpop.f32.mrf.mxu2 }
 0x4ee   :  { %v1411_v49 = vpop.f32.mrf.mxu3  ;;  %v1389_v63 = vadd.f32 %v1388_v48, %v1366_v61 }
 0x4f0   :  { %v1412_v24 = vadd.f32 %v1411_v49, %v1389_v63 }
 0x4f2   :  { %v1435_v8 = vadd.f32 %v1434_v50, %v1412_v24  ;;  %v1801_v24 = vld [vmem:[%s3451_s20 + $0x18] sm:$0xff] }
 0x4f3   :  { %1821 = vmatpush.msrb.mxu2 %v1801_v24 }
 0x4f4   :  { %v1457_v55 = vpop.f32.mrf.mxu1 }
 0x4f5   :  { %v1526_v59 = vpop.f32.mrf.mxu0  ;;  %v1458_v10 = vadd.f32 %v1457_v55, %v1435_v8  ;;  %v1798_v8 = vld [vmem:[%s3451_s20] sm:$0xff] }
 0x4f7   :  { %v1391_v52 = vpop.f32.mrf.mxu2 }
 0x4f8   :  { %v1414_v53 = vpop.f32.mrf.mxu3  ;;  %v1392_v0 = vadd.f32 %v1391_v52, %v1369_v62 }
 0x4fa   :  { %v1415_v4 = vadd.f32 %v1414_v53, %v1392_v0 }
 0x4fc   :  { %v1438_v9 = vadd.f32 %v1437_v54, %v1415_v4  ;;  %v1800_v4 = vld [vmem:[%s3451_s20 + $0x10] sm:$0xff] }
 0x4fd   :  { %1822 = vmatpush.msrb.mxu2 %v1800_v4 }
 0x4fe   :  { %v1460_v60 = vpop.f32.mrf.mxu1 }
 0x4ff   :  { %v1529_v3 = vpop.f32.mrf.mxu0  ;;  %v1461_v11 = vadd.f32 %v1460_v60, %v1438_v9 }
 0x501   :  { %v1480_v56 = vpop.f32.mrf.mxu2 }
 0x502   :  { %v1503_v58 = vpop.f32.mrf.mxu3  ;;  %v1481_v13 = vadd.f32 %v1480_v56, %v1458_v10 }
 0x504   :  { %v1504_v19 = vadd.f32 %v1503_v58, %v1481_v13 }
 0x506   :  { %v1527_v22 = vadd.f32 %v1526_v59, %v1504_v19 }
 0x509   :  { %v1549_v6 = vpop.f32.mrf.mxu1 }
 0x50a   :  { %v1550_v28 = vadd.f32 %v1549_v6, %v1527_v22 }
 0x50b   :  { %v1483_v20 = vpop.f32.mrf.mxu2  ;;  %v1618_v16 = vpop.f32.mrf.mxu0 }
 0x50c   :  { %v1506_v5 = vpop.f32.mrf.mxu3  ;;  %v1484_v14 = vadd.f32 %v1483_v20, %v1461_v11 }
 0x50e   :  { %v1507_v21 = vadd.f32 %v1506_v5, %v1484_v14 }
 0x510   :  { %v1530_v23 = vadd.f32 %v1529_v3, %v1507_v21  ;;  %v1799_v3 = vld [vmem:[%s3451_s20 + $0x8] sm:$0xff] }
 0x511   :  { %1823 = vmatpush.msrb.mxu2 %v1799_v3 }
 0x513   :  { %1824 = vmatpush.msrb.mxu2 %v1798_v8 }
 0x514   :  { %v1552_v17 = vpop.f32.mrf.mxu1 }
 0x515   :  { %v1621_v27 = vpop.f32.mrf.mxu0  ;;  %v1553_v29 = vadd.f32 %v1552_v17, %v1530_v23  ;;  %v1931_v23 = vld [vmem:[%s3450_s19] ss:$0 sm:$0xff]  ;;  %s2008_s19 = smov [#allocation2]  }
 0x516   :  { %s1838_s6 = sshll.u32 %s2008_s19, 4  ;;  %s1839_s6 = int_to_ptr.vmem [resolvable:$true] %s1838_s6 }
 0x517   :  { %v1572_v12 = vpop.f32.mrf.mxu2 }
 0x518   :  { %v1595_v7 = vpop.f32.mrf.mxu3  ;;  %v1573_v30 = vadd.f32 %v1572_v12, %v1550_v28 }
 0x51a   :  { %v1596_v33 = vadd.f32 %v1595_v7, %v1573_v30 }
 0x51c   :  { %v1619_v37 = vadd.f32 %v1618_v16, %v1596_v33  ;;  %v1774_v33 = vld [vmem:[%s3455_s24] sm:$0x3]  ;;  %s2009_s24 = smov [#allocation4]  }
 0x51d   :  { %s1849_s13 = sshll.u32 %s2009_s24, 4  ;;  %s1850_s13 = int_to_ptr.vmem [resolvable:$true] %s1849_s13 }
 0x521   :  { %v1575_v25 = vpop.f32.mrf.mxu2 }
 0x522   :  { %v1598_v26 = vpop.f32.mrf.mxu3  ;;  %v1576_v31 = vadd.f32 %v1575_v25, %v1553_v29 }
 0x524   :  { %v1599_v47 = vadd.f32 %v1598_v26, %v1576_v31 }
 0x526   :  { %v1622_v38 = vadd.f32 %v1621_v27, %v1599_v47 }
 0x52c   :  { %v1641_v15 = vpop.f32.mrf.mxu1 }
 0x52d   :  { %v1710_v35 = vpop.f32.mrf.mxu0  ;;  %v1642_v39 = vadd.f32 %v1641_v15, %v1619_v37 }
 0x534   :  { %v1644_v36 = vpop.f32.mrf.mxu1 }
 0x535   :  { %v1645_v40 = vadd.f32 %v1644_v36, %v1622_v38  ;;  %v1713_v46 = vpop.f32.mrf.mxu0 }
 0x538   :  { %v1664_v32 = vpop.f32.mrf.mxu2 }
 0x539   :  { %v1687_v34 = vpop.f32.mrf.mxu3  ;;  %v1665_v42 = vadd.f32 %v1664_v32, %v1642_v39 }
 0x53b   :  { %v1688_v48 = vadd.f32 %v1687_v34, %v1665_v42  ;;  %v1932_v34 = vld [vmem:[%s3452_s21] ss:$0 sm:$0xff] }
 0x53d   :  { %v1711_v51 = vadd.f32 %v1710_v35, %v1688_v48 }
 0x53f   :  { %v1716_v53 = vadd.f32 %v1711_v51, %v2395_v2 }
 0x540   :  { %v1667_v41 = vpop.f32.mrf.mxu2 }
 0x541   :  { %v1668_v43 = vadd.f32 %v1667_v41, %v1645_v40  ;;  %v1690_v44 = vpop.f32.mrf.mxu3  ;;  %v1718_v54 = vsel %vm134_vm1, %v1716_v53, 0.0 }
 0x543   :  { %v1691_v45 = vadd.f32 %v1690_v44, %v1668_v43 }
 0x545   :  { %v1714_v49 = vadd.f32 %v1713_v46, %v1691_v45 }
 0x547   :  { %v1717_v50 = vadd.f32 %v1714_v49, %v2442_v18 }
 0x549   :  { %v1721_v52 = vsel %vm134_vm1, %v1717_v50, 0.0 }
 0x54a   :  { %1722 = vadd.xlane.f32.xlu2 %v1721_v52 }
 0x552   :  { %1719 = vadd.xlane.f32.xlu2 %v1718_v54 }
 0x5bd   :  { %v1723_v55 = vpop.xlane.xlu2 %1722 }
 0x5be   :  { %v1725_v56 = vmul.f32 %v1723_v55, %v2276_v1 }
 0x5c0   :  { %v1727_v57 = vsub.f32 %v1717_v50, %v1725_v56 }
 0x5c2   :  { %v1729_v58 = vmul.f32 %v1727_v57, %v1727_v57 }
 0x5c4   :  { %v1733_v59 = vsel %vm134_vm1, %v1729_v58, 0.0 }
 0x5c5   :  { %1734 = vadd.xlane.f32.xlu0 %v1733_v59  ;;  %v1720_v60 = vpop.xlane.xlu2 %1719 }
 0x5c6   :  { %v1724_v18 = vmul.f32 %v1720_v60, %v2276_v1 }
 0x5c8   :  { %v1726_v61 = vsub.f32 %v1716_v53, %v1724_v18 }
 0x5ca   :  { %v1728_v62 = vmul.f32 %v1726_v61, %v1726_v61 }
 0x5cc   :  { %v1730_v63 = vsel %vm134_vm1, %v1728_v62, 0.0 }
 0x5cd   :  { %1731 = vadd.xlane.f32.xlu1 %v1730_v63 }
 0x638   :  { %v1735_v2 = vpop.xlane.xlu0 %1734 }
 0x639   :  { %v1737_v0 = vmul.f32 %v1735_v2, %v2276_v1 }
 0x63b   :  { %v1739_v20 = vadd.f32 1e-05, %v1737_v0 }
 0x63d   :  { %1951 = vrsqrt.f32 %v1739_v20  ;;  %vm1756_vm4 = vweird.f32 %v1739_v20 }
 0x640   :  { %v1732_v5 = vpop.xlane.xlu1 %1731 }
 0x641   :  { %v1736_v6 = vmul.f32 %v1732_v5, %v2276_v1  ;;  %v1930_v1 = vld [vmem:[%s3449_s18] ss:$0 sm:$0xff] }
 0x643   :  { %v1952_v9 = vpop.eup %1951  ;;  %v1738_v10 = vadd.f32 1e-05, %v1736_v6 }
 0x644   :  { %v1751_v11 = vmul.f32 %v1952_v9, %v1739_v20  ;;  %vm1757_vm3 = vweird.f32 %v1952_v9 }
 0x645   :  { %1953 = vrsqrt.f32 %v1738_v10  ;;  %vm1758_vm5 = vmor %vm1756_vm4, %vm1757_vm3  ;;  %vm1746_vm7 = vweird.f32 %v1738_v10 }
 0x646   :  { %v1752_v12 = vmul.f32 %v1952_v9, %v1751_v11 }
 0x648   :  { %v1753_v13 = vmul.f32 0.5, %v1752_v12 }
 0x64a   :  { %v1754_v14 = vsub.f32 1.5, %v1753_v13 }
 0x64b   :  { %v1954_v7 = vpop.eup %1953 }
 0x64c   :  { %v1755_v16 = vmul.f32 %v1952_v9, %v1754_v14  ;;  %v1741_v17 = vmul.f32 %v1954_v7, %v1738_v10  ;;  %vm1747_vm6 = vweird.f32 %v1954_v7 }
 0x64d   :  { %vm1748_vm8 = vmor %vm1746_vm7, %vm1747_vm6 }
 0x64e   :  { %v1759_v19 = vsel %vm1758_vm5, %v1952_v9, %v1755_v16  ;;  %v1742_v21 = vmul.f32 %v1954_v7, %v1741_v17 }
 0x64f   :  { %v1761_v22 = vmul.f32 %v1759_v19, %v1727_v57 }
 0x650   :  { %v1743_v25 = vmul.f32 0.5, %v1742_v21 }
 0x651   :  { %v1767_v26 = vmul.f32 %v1930_v1, %v1761_v22 }
 0x652   :  { %v1744_v27 = vsub.f32 1.5, %v1743_v25 }
 0x653   :  { %v1773_v15 = vadd.f32 %v1931_v23, %v1767_v26 }
 0x654   :  { %v1745_v28 = vmul.f32 %v1954_v7, %v1744_v27 }
 0x655   :  { %1792 = vmatpush.msrb.mxu1 %v1773_v15 }
 0x656   :  { %v1749_v29 = vsel %vm1748_vm8, %v1954_v7, %v1745_v28 }
 0x657   :  { %v1760_v30 = vmul.f32 %v1749_v29, %v1726_v61 }
 0x659   :  { %v1766_v31 = vmul.f32 %v1930_v1, %v1760_v30 }
 0x65b   :  { %v1772_v32 = vadd.f32 %v1931_v23, %v1766_v31 }
 0x65d   :  { %1793 = vmatpush.msrb.mxu1 %v1772_v32 }
 0x65e   :  { %1915 = vmatmul.msk.f32.vlgmr.msrb.gmra.mxu1 %vm92_vm0, %v1774_v33  ;;  %vm1831_vm0 = vcmask 517120  }
 0x6db   :  { %v1795_v47 = vpop.f32.mrf.mxu1 }
 0x6dc   :  { %1830 = vst.msk [vmem:[#allocation2] sm:$0x3] %vm1829_vm9, %v1795_v47  ;;  %1916 = vmatmul.msk.f32.vlgmr.msrb.gmra.mxu2 %vm134_vm1, %v1795_v47 }
 0x6dd   :  { %1843 = dma.vmem_to_hbm [thread:$0]  %s1839_s6, 32, %s1841_s7, [#allocation3]  }
 0x75f   :  { %v1826_v35 = vpop.f32.mrf.mxu2 }
 0x760   :  { %v1827_v36 = vadd.f32 %v1932_v34, %v1826_v35 }
 0x762   :  { %1832 = vst.msk [vmem:[#allocation4] sm:$0x3] %vm1831_vm0, %v1827_v36 }
 0x763   :  { %1854 = dma.vmem_to_hbm [thread:$0]  %s1850_s13, 32, %s1852_s27, [#allocation5]  }
 0x764   :  { %2003 = dma.done.wait [#allocation3], 32  }
 0x765   :  { %2004 = vsyncadd [#allocation3], 4294967264 }
 0x766   :  { %2005 = dma.done.wait [#allocation5], 32  }
 0x767   :  { %2006 = vsyncadd [#allocation5], 4294967264 }
 0x768   :  { %1863 = vsyncpa [#allocation3], 1 }
 0x769   :  { %1864 = vsyncpa [#allocation5], 1 }

</bundles_post_ra>
